<compile_context>
chip_gen: v5e
topology: v5e:2x2
jax: 0.10.0
libtpu: 0.0.40
codegen_flags: <defaults>
</compile_context>

<pallas_src>
import functools

import jax
import jax.numpy as jnp
import numpy as np
from jax.experimental import pallas as pl
from jax.experimental.pallas import tpu as pltpu

# ----------------------------- configuration --------------------------------
L = 4                        # args.L
IN_COMPLEX = 4               # complex feature dim of y_vec
INPUT_SIZE = 2 * IN_COMPLEX  # detector input size (view_as_real + flatten)
LOSS_ALPHA = 0.5             # args.loss_alpha
HIDDEN = [100, 300, 300, 100, 50, 2 * L]      # detector layer widths

LANES = 128
# padded (in, out) dims for the 6 detector layers (vreg/MXU friendly)
PAD_IN = [128, 128, 384, 384, 128, 128]
PAD_OUT = [128, 384, 384, 128, 128, 128]

# Packed weight slabs (built once in prepare_params):
#   slab A (lane width 128): layers 1, 4, 5, 6 stacked along rows
#   slab B (lane width 384): layers 2, 3 stacked along rows
WA_ROWS = (0, 128, 512, 640, 768)   # layer1, layer4, layer5, layer6 row offsets
WB_ROWS = (0, 128, 512)             # layer2, layer3 row offsets

# lane layout of the per-row output slab
WP_OFF = 2 * L          # weighted_prob (2 lanes)
YH_OFF = 2 * L + 2      # y_hat re/im (2 lanes)
LOSS_OFF = 2 * L + 4    # per-block partials: sum(sq err), sum(log p_class)

# lane layout of the input slab: [y_vec(2*IN_COMPLEX), y_re, y_im, pilot_re, 0.., 1]
YRE_LANE = 2 * IN_COMPLEX          # 8
YIM_LANE = YRE_LANE + 1            # 9
PIL_LANE = YRE_LANE + 2            # 10


# ------------------------------ Pallas kernel -------------------------------
def _naive_kernel(x_ref, wa_ref, wb_ref, sp_ref, out_ref, *, pilot_len, n_valid):
    """Fused detector MLP + vectorized per-tap sharpening + loss partials.

    One grid step processes one (block_m, 128) slab of symbols. The two
    weight slabs have constant index_maps, so they are DMA'd once and stay
    VMEM-resident across grid steps. Biases are folded into the last
    ("ones") row of each padded weight matrix, so each layer is one dense
    full-tile dot.
    """
    b = pl.program_id(0)
    bm = x_ref.shape[0]
    x = x_ref[...]                                    # (bm, 128) f32

    def dense(h, w, relu=True):
        out = jnp.dot(h.astype(w.dtype), w, preferred_element_type=jnp.float32)
        return jnp.maximum(out, 0.0) if relu else out

    # static, tile-aligned row slices of the resident weight slabs
    h1 = dense(x,  wa_ref[WA_ROWS[0]:WA_ROWS[1], :])          # (bm, 128)
    h2 = dense(h1, wb_ref[WB_ROWS[0]:WB_ROWS[1], :])          # (bm, 384)
    h3 = dense(h2, wb_ref[WB_ROWS[1]:WB_ROWS[2], :])          # (bm, 384)
    h4 = dense(h3, wa_ref[WA_ROWS[1]:WA_ROWS[2], :])          # (bm, 128)
    h5 = dense(h4, wa_ref[WA_ROWS[2]:WA_ROWS[3], :])          # (bm, 128)
    xp = dense(h5, wa_ref[WA_ROWS[3]:WA_ROWS[4], :], relu=False)
    # xp: lanes 0..L-1 = class-0 logits, lanes L..2L-1 = class-1 logits, rest 0

    sp = sp_ref[...]                                  # (1, 128) scalar pack
    exp_t = jnp.exp(sp[:, 0:2 * L])                   # one EUP push for all taps
    et0 = exp_t[:, 0:L]
    et1 = exp_t[:, L:2 * L]
    hmag = sp[:, 2 * L:3 * L]                         # (1, L)
    coef = hmag / jnp.sum(hmag, axis=-1, keepdims=True)
    h_re = sp[:, 3 * L:4 * L]
    h_im = sp[:, 4 * L:5 * L]

    # vectorized per-tap 2-way softmax == stable sigmoid (one exp, one divide)
    c0 = xp[:, 0:L]                                   # (bm, L)
    c1 = xp[:, L:2 * L]
    s0 = et0 * c0
    s1 = et1 * c1
    d = s1 - s0
    e = jnp.exp(-jnp.abs(d))
    p_big = 1.0 / (1.0 + e)
    p1 = jnp.where(d >= 0.0, p_big, 1.0 - p_big)      # softmax class-1 prob
    p0 = 1.0 - p1                                     # softmax class-0 prob

    # per-tap triangular mask on GLOBAL rows: tap l zeroed for rows < L-1-l
    grow_l = b * bm + jax.lax.broadcasted_iota(jnp.int32, (bm, L), 0)
    col_l = jax.lax.broadcasted_iota(jnp.int32, (bm, L), 1)
    tap_mask = ((grow_l + col_l) >= (L - 1)).astype(jnp.float32)

    wc0 = coef * p0 * tap_mask                        # weighted class-0 probs
    wc1 = coef * p1 * tap_mask                        # weighted class-1 probs
    wp0 = jnp.sum(wc0, axis=-1, keepdims=True)        # (bm, 1)
    wp1 = jnp.sum(wc1, axis=-1, keepdims=True)
    s_hat = wc1 - wc0                                 # (bm, L) = sum(w * [-1, 1])

    # y_hat = view_as_real((s_hat * h_hat).sum(-1))
    y_hat_re = jnp.sum(s_hat * h_re, axis=-1, keepdims=True)
    y_hat_im = jnp.sum(s_hat * h_im, axis=-1, keepdims=True)

    grow = b * bm + jax.lax.broadcasted_iota(jnp.int32, (bm, 1), 0)
    valid = (grow < n_valid).astype(jnp.float32)      # mask padded rows

    # partial MSE numerator (block-local sum of squared errors, valid rows)
    dre = y_hat_re - x[:, YRE_LANE:YRE_LANE + 1]
    dim = y_hat_im - x[:, YIM_LANE:YIM_LANE + 1]
    sq_sum = jnp.sum((dre * dre + dim * dim) * valid, axis=0, keepdims=True)

    # partial NLL numerator restricted to the pilot window (safe log: no -inf)
    window = jnp.logical_and(grow >= L - 1, grow < L - 1 + pilot_len)
    cls1 = (x[:, PIL_LANE:PIL_LANE + 1] >= 0.0).astype(jnp.float32)  # sign test
    wp0s = jnp.where(window, wp0, 1.0)
    wp1s = jnp.where(window, wp1, 1.0)
    picked = cls1 * jnp.log(wp1s) + (1.0 - cls1) * jnp.log(wp0s)     # 0 outside
    logp_sum = jnp.sum(picked, axis=0, keepdims=True)

    # compose the lane-dense output slab in registers -> one full-width store
    lane = jax.lax.broadcasted_iota(jnp.int32, (bm, LANES), 1)
    slab = xp                                          # x_prob in lanes 0..2L-1
    slab = jnp.where(lane == WP_OFF, wp0, slab)
    slab = jnp.where(lane == WP_OFF + 1, wp1, slab)
    slab = jnp.where(lane == YH_OFF, y_hat_re, slab)
    slab = jnp.where(lane == YH_OFF + 1, y_hat_im, slab)
    slab = jnp.where(lane == LOSS_OFF, sq_sum, slab)
    slab = jnp.where(lane == LOSS_OFF + 1, logp_sum, slab)
    out_ref[...] = slab


# --------------------------------- wrapper -----------------------------------
def _view_as_real(z):
    return jnp.stack([jnp.real(z), jnp.imag(z)], axis=-1)


def prepare_params(params, weight_dtype=jnp.float32):
    """One-time packing (outside jit) of PyTorch-style params:
    zero-padded weights with the bias folded into a trailing 'ones' row and a
    ones-propagation bit, the last layer's columns permuted to class-major,
    and everything coalesced into two contiguous HBM slabs (one per lane
    width) so the kernel needs only 2 weight DMAs.

    weight_dtype=jnp.bfloat16 halves the weight HBM traffic (useful on
    DMA-bound v5e/v6e); the default f32 preserves the PyTorch reference
    numerics exactly.
    """
    temp = params["temp"].astype(jnp.float32)
    n_layers = len(params["detector"])
    perm_last = jnp.array([2 * i for i in range(L)] + [2 * i + 1 for i in range(L)],
                          dtype=jnp.int32)
    padded = []
    for i, (w, b) in enumerate(params["detector"]):
        w = w.astype(jnp.float32)
        b = b.astype(jnp.float32)
        if i == n_layers - 1:
            w = w[:, perm_last]          # class-major output layout
            b = b[perm_last]
        in_dim, out_dim = w.shape
        wp = jnp.zeros((PAD_IN[i], PAD_OUT[i]), jnp.float32)
        wp = wp.at[:in_dim, :out_dim].set(w)
        wp = wp.at[PAD_IN[i] - 1, :out_dim].set(b)              # bias row
        if i < n_layers - 1:
            wp = wp.at[PAD_IN[i] - 1, PAD_OUT[i] - 1].set(1.0)  # ones propagation
        padded.append(wp)
    wa = jnp.concatenate([padded[0], padded[3], padded[4], padded[5]],
                         axis=0).astype(weight_dtype)           # (768, 128)
    wb = jnp.concatenate([padded[1], padded[2]],
                         axis=0).astype(weight_dtype)           # (512, 384)
    return {"wa": wa, "wb": wb, "temp": temp}


def naive_forward(prepped, y, y_vec, h, pilot, *, block_m=8):
    """Forward pass matching Naive.forward.
    Returns (loss, y_hat, x_prob, weighted_prob, loss1, loss2).

    block_m: rows per grid step (multiple of 8).  For large batches use
    block_m >= 256 to fill the 256x256 MXU; at demo sizes 8 is enough.
    """
    f32 = jnp.float32
    n = y_vec.shape[0]
    pilot_length = pilot.shape[0]
    n_blocks = pl.cdiv(n, block_m)
    n_pad = n_blocks * block_m

    # complex glue (Pallas TPU has no complex dtype): split into re/im here.
    h_hat = h[0]                                                  # (L,) complex
    hmag = jnp.abs(h_hat).astype(f32).reshape(1, L)
    h_re = jnp.real(h_hat).astype(f32).reshape(1, L)
    h_im = jnp.imag(h_hat).astype(f32).reshape(1, L)

    # torch.flatten(torch.view_as_real(y_vec), -2, -1)
    yv = _view_as_real(y_vec).reshape(n, 2 * IN_COMPLEX).astype(f32)
    y_re = jnp.real(y).astype(f32).reshape(n, 1)
    y_im = jnp.imag(y).astype(f32).reshape(n, 1)
    pil_col = jnp.zeros((n, 1), f32).at[L - 1:L - 1 + pilot_length, 0].set(
        jnp.real(pilot[:, -1]).astype(f32))

    # lane-dense (n_pad, 128) input slab: features + y + pilot + bias-ones lane
    x_slab = jnp.concatenate(
        [yv, y_re, y_im, pil_col,
         jnp.zeros((n, LANES - (2 * IN_COMPLEX + 3) - 1), f32),
         jnp.ones((n, 1), f32)], axis=-1)
    if n_pad > n:
        x_slab = jnp.pad(x_slab, ((0, n_pad - n), (0, 0)))

    # (1,128) scalar pack: temp (class-major), |h_hat|, Re(h_hat), Im(h_hat)
    spack = jnp.concatenate(
        [prepped["temp"].T.reshape(1, 2 * L), hmag, h_re, h_im,
         jnp.zeros((1, LANES - 5 * L), f32)], axis=-1)

    wa, wb = prepped["wa"], prepped["wb"]
    wbytes = (wa.size + wb.size) * wa.dtype.itemsize
    flops = 2 * n_pad * sum(pi * po for pi, po in zip(PAD_IN, PAD_OUT))
    bytes_accessed = int(wbytes) + (2 * n_pad + 1) * LANES * 4
    transcendentals = n_pad * (L + 2) + 2 * L

    kernel = functools.partial(_naive_kernel, pilot_len=pilot_length, n_valid=n)

    slab = pl.pallas_call(
        kernel,
        out_shape=jax.ShapeDtypeStruct((n_pad, LANES), f32),
        grid=(n_blocks,),
        in_specs=[
            pl.BlockSpec((block_m, LANES), lambda i: (i, 0)),   # per-block symbols
            pl.BlockSpec(wa.shape, lambda i: (0, 0)),           # weight slab A (resident)
            pl.BlockSpec(wb.shape, lambda i: (0, 0)),           # weight slab B (resident)
            pl.BlockSpec((1, LANES), lambda i: (0, 0)),         # scalar pack (resident)
        ],
        out_specs=pl.BlockSpec((block_m, LANES), lambda i: (i, 0)),
        compiler_params=pltpu.CompilerParams(
            dimension_semantics=("parallel",)),
        cost_estimate=pl.CostEstimate(
            flops=int(flops), transcendentals=int(transcendentals),
            bytes_accessed=int(bytes_accessed)),
    )(x_slab, wa, wb, spack)

    # unpack the slab (tiny wrapper-side slices)
    xp_cm = slab[:n, :2 * L]                                     # class-major
    x_prob = jnp.stack([xp_cm[:, :L], xp_cm[:, L:2 * L]], axis=-1).reshape(n, 2 * L)
    weighted_prob = slab[:n, WP_OFF:WP_OFF + 2]
    y_hat = slab[:n, YH_OFF:YH_OFF + 2]

    # combine per-block loss partials (keeps the batch grid axis fully parallel)
    parts = slab.reshape(n_blocks, block_m, LANES)[:, 0, :]
    loss1 = (LOSS_ALPHA / (2.0 * n)) * jnp.sum(parts[:, LOSS_OFF])
    loss2 = (-1.0 / pilot_length) * jnp.sum(parts[:, LOSS_OFF + 1])
    loss = loss1 + loss2
    return loss, y_hat, x_prob, weighted_prob, loss1, loss2


# ----------------------------- pure-JAX reference ----------------------------
def naive_reference(params, y, y_vec, h, pilot):
    """Faithful pure-JAX transcription of Naive.forward (numerical reference)."""
    n = y_vec.shape[0]
    p_len = pilot.shape[0]
    h_hat = h[0]
    pilot_real = jnp.real(pilot[:, -1])
    pilot_class = jnp.where(pilot_real == -1.0, 0, 1)
    x = _view_as_real(y_vec).reshape(n, 2 * IN_COMPLEX).astype(jnp.float32)
    n_layers = len(params["detector"])
    for i, (w, b) in enumerate(params["detector"]):
        x = jnp.dot(x, w, precision=jax.lax.Precision.HIGHEST) + b
        if i < n_layers - 1:
            x = jnp.maximum(x, 0.0)
    x_prob = x                                                   # (N, 2L)
    hmag = jnp.abs(h_hat)
    coef = hmag / hmag.sum()
    rows = jnp.arange(n)
    wp_list, s_list = [], []
    for l in range(L):
        start = L - 1 - l
        logits = jnp.exp(params["temp"][l]) * x_prob[:, 2 * l:2 * (l + 1)]
        sharpen = jax.nn.softmax(logits, axis=-1)
        wpt = coef[l] * sharpen                                  # (N, 2)
        st = (wpt * jnp.array([-1.0, 1.0])).sum(-1)              # (N,)
        keep = (rows >= start).astype(jnp.float32)
        wpt = wpt * keep[:, None]
        st = st * keep
        wp_list.append(wpt[..., None])
        s_list.append(st[..., None])
    weighted_prob = jnp.concatenate(wp_list, -1).sum(-1)         # (N, 2)
    s_hat = jnp.concatenate(s_list, -1)                          # (N, L)
    y_hat = _view_as_real((s_hat * h_hat).sum(-1))               # (N, 2)
    y_real = _view_as_real(y)
    loss1 = LOSS_ALPHA * jnp.mean((y_hat - y_real) ** 2)
    wlog = jnp.log(weighted_prob[L - 1:L - 1 + p_len])
    loss2 = -jnp.mean(wlog[jnp.arange(p_len), pilot_class])
    loss = loss1 + loss2
    return loss, y_hat, x_prob, weighted_prob, loss1, loss2


# ----------------------------- parameter init --------------------------------
def init_params(key):
    dims = [INPUT_SIZE] + HIDDEN
    layers = []
    for i in range(len(HIDDEN)):
        key, kw, kb = jax.random.split(key, 3)
        bound = float(dims[i]) ** -0.5          # PyTorch-style uniform init
        w = jax.random.uniform(kw, (dims[i], dims[i + 1]), jnp.float32,
                               minval=-bound, maxval=bound)
        b = jax.random.uniform(kb, (dims[i + 1],), jnp.float32,
                               minval=-bound, maxval=bound)
        layers.append((w, b))
    temp = jnp.zeros((L, 2), jnp.float32)       # nn.Parameter(zeros(L, 2))
    return {"detector": layers, "temp": temp}


# ----------------------------------- main ------------------------------------
if __name__ == "__main__":
    key = jax.random.PRNGKey(0)
    kp, k1, k2, k3, k4, k5, k6 = jax.random.split(key, 7)
    params = init_params(kp)
    prepped = prepare_params(params)            # one-time packing (outside jit)

    N = 16           # number of received symbols -> grid=(2,) of 8-row blocks
    P = 3            # pilot length

    y = (jax.random.normal(k1, (N,)) +
         1j * jax.random.normal(k2, (N,))).astype(jnp.complex64)
    y_vec = (jax.random.normal(k3, (N, IN_COMPLEX)) +
             1j * jax.random.normal(k4, (N, IN_COMPLEX))).astype(jnp.complex64)
    h = (jax.random.normal(k5, (2, L)) +
         1j * jax.random.normal(k6, (2, L))).astype(jnp.complex64)
    # pilot: (P, 2) complex; last column holds BPSK symbols with real parts +-1
    pilot_sym = jnp.array([-1.0, 1.0, -1.0], jnp.float32)
    pilot = jnp.stack([jnp.zeros_like(pilot_sym), pilot_sym],
                      axis=-1).astype(jnp.complex64)

    fwd = jax.jit(naive_forward)
    outs = fwd(prepped, y, y_vec, h, pilot)
    jax.block_until_ready(outs)
    loss, y_hat, x_prob, weighted_prob, loss1, loss2 = outs

    assert y_hat.shape == (N, 2)
    assert x_prob.shape == (N, 2 * L)
    assert weighted_prob.shape == (N, 2)
    assert bool(jnp.isfinite(loss))
    assert bool(jnp.isfinite(loss1)) and bool(jnp.isfinite(loss2))

    # numerical check vs. a pure-JAX transcription of the PyTorch module.
    # Tolerance accommodates the MXU's emulated-f32 matmul passes.
    ref = naive_reference(params, y, y_vec, h, pilot)
    for got, want in zip(outs, ref):
        np.testing.assert_allclose(np.asarray(got), np.asarray(want),
                                   rtol=5e-2, atol=5e-3)

    print("KERNEL_OK")
</pallas_src>

<mosaic_0001>
module attributes {stable_mosaic.version = 11 : i64} {
  func.func @_naive_kernel(%arg0: i32, %arg1: memref<8x128xf32, #tpu.memory_space<vmem>>, %arg2: memref<768x128xf32, #tpu.memory_space<vmem>>, %arg3: memref<512x384xf32, #tpu.memory_space<vmem>>, %arg4: memref<1x128xf32, #tpu.memory_space<vmem>>, %arg5: memref<8x128xf32, #tpu.memory_space<vmem>>) attributes {dimension_semantics = [#tpu.dimension_semantics<parallel>], iteration_bounds = array<i64: 2>, scalar_prefetch = 0 : i64, scratch_operands = 0 : i64, tpu.core_type = #tpu.core_type<tc>, window_params = [{transform_indices = @transform_0, window_bounds = array<i64: 8, 128>}, {pipeline_mode = #tpu.pipeline_mode<synchronous>, transform_indices = @transform_1, window_bounds = array<i64: 768, 128>}, {pipeline_mode = #tpu.pipeline_mode<synchronous>, transform_indices = @transform_2, window_bounds = array<i64: 512, 384>}, {pipeline_mode = #tpu.pipeline_mode<synchronous>, transform_indices = @transform_3, window_bounds = array<i64: 1, 128>}, {transform_indices = @transform_4, window_bounds = array<i64: 8, 128>}]} {
    %c0 = arith.constant 0 : index
    %c0_0 = arith.constant 0 : index
    %0 = vector.load %arg1[%c0, %c0_0] : memref<8x128xf32, #tpu.memory_space<vmem>>, vector<8x128xf32>
    %c0_1 = arith.constant 0 : index
    %c0_2 = arith.constant 0 : index
    %1 = vector.load %arg2[%c0_1, %c0_2] : memref<768x128xf32, #tpu.memory_space<vmem>>, vector<128x128xf32>
    %cst = arith.constant dense<0.000000e+00> : vector<8x128xf32>
    %2 = tpu.matmul %0, %1, %cst {dimension_numbers = #tpu.dot_dimension_numbers<[1], [0], [0], [1], [0, 0, 1, 1], [], []>} : vector<8x128xf32>, vector<128x128xf32>, vector<8x128xf32> -> vector<8x128xf32>
    %cst_3 = arith.constant 0.000000e+00 : f32
    %3 = vector.broadcast %cst_3 : f32 to vector<8x128xf32>
    %4 = arith.maximumf %2, %3 : vector<8x128xf32>
    %c0_4 = arith.constant 0 : index
    %c0_5 = arith.constant 0 : index
    %5 = vector.load %arg3[%c0_4, %c0_5] : memref<512x384xf32, #tpu.memory_space<vmem>>, vector<128x384xf32>
    %cst_6 = arith.constant dense<0.000000e+00> : vector<8x384xf32>
    %6 = tpu.matmul %4, %5, %cst_6 {dimension_numbers = #tpu.dot_dimension_numbers<[1], [0], [0], [1], [0, 0, 1, 1], [], []>} : vector<8x128xf32>, vector<128x384xf32>, vector<8x384xf32> -> vector<8x384xf32>
    %cst_7 = arith.constant 0.000000e+00 : f32
    %7 = vector.broadcast %cst_7 : f32 to vector<8x384xf32>
    %8 = arith.maximumf %6, %7 : vector<8x384xf32>
    %c128 = arith.constant 128 : index
    %c0_8 = arith.constant 0 : index
    %9 = vector.load %arg3[%c128, %c0_8] : memref<512x384xf32, #tpu.memory_space<vmem>>, vector<384x384xf32>
    %cst_9 = arith.constant dense<0.000000e+00> : vector<8x384xf32>
    %10 = tpu.matmul %8, %9, %cst_9 {dimension_numbers = #tpu.dot_dimension_numbers<[1], [0], [0], [1], [0, 0, 1, 1], [], []>} : vector<8x384xf32>, vector<384x384xf32>, vector<8x384xf32> -> vector<8x384xf32>
    %cst_10 = arith.constant 0.000000e+00 : f32
    %11 = vector.broadcast %cst_10 : f32 to vector<8x384xf32>
    %12 = arith.maximumf %10, %11 : vector<8x384xf32>
    %c128_11 = arith.constant 128 : index
    %c0_12 = arith.constant 0 : index
    %13 = vector.load %arg2[%c128_11, %c0_12] : memref<768x128xf32, #tpu.memory_space<vmem>>, vector<384x128xf32>
    %cst_13 = arith.constant dense<0.000000e+00> : vector<8x128xf32>
    %14 = tpu.matmul %12, %13, %cst_13 {dimension_numbers = #tpu.dot_dimension_numbers<[1], [0], [0], [1], [0, 0, 1, 1], [], []>} : vector<8x384xf32>, vector<384x128xf32>, vector<8x128xf32> -> vector<8x128xf32>
    %cst_14 = arith.constant 0.000000e+00 : f32
    %15 = vector.broadcast %cst_14 : f32 to vector<8x128xf32>
    %16 = arith.maximumf %14, %15 : vector<8x128xf32>
    %c512 = arith.constant 512 : index
    %c0_15 = arith.constant 0 : index
    %17 = vector.load %arg2[%c512, %c0_15] : memref<768x128xf32, #tpu.memory_space<vmem>>, vector<128x128xf32>
    %cst_16 = arith.constant dense<0.000000e+00> : vector<8x128xf32>
    %18 = tpu.matmul %16, %17, %cst_16 {dimension_numbers = #tpu.dot_dimension_numbers<[1], [0], [0], [1], [0, 0, 1, 1], [], []>} : vector<8x128xf32>, vector<128x128xf32>, vector<8x128xf32> -> vector<8x128xf32>
    %cst_17 = arith.constant 0.000000e+00 : f32
    %19 = vector.broadcast %cst_17 : f32 to vector<8x128xf32>
    %20 = arith.maximumf %18, %19 : vector<8x128xf32>
    %c640 = arith.constant 640 : index
    %c0_18 = arith.constant 0 : index
    %21 = vector.load %arg2[%c640, %c0_18] : memref<768x128xf32, #tpu.memory_space<vmem>>, vector<128x128xf32>
    %cst_19 = arith.constant dense<0.000000e+00> : vector<8x128xf32>
    %22 = tpu.matmul %20, %21, %cst_19 {dimension_numbers = #tpu.dot_dimension_numbers<[1], [0], [0], [1], [0, 0, 1, 1], [], []>} : vector<8x128xf32>, vector<128x128xf32>, vector<8x128xf32> -> vector<8x128xf32>
    %c0_20 = arith.constant 0 : index
    %c0_21 = arith.constant 0 : index
    %23 = vector.load %arg4[%c0_20, %c0_21] : memref<1x128xf32, #tpu.memory_space<vmem>>, vector<1x128xf32>
    %24 = vector.extract_strided_slice %23 {offsets = [0, 0], sizes = [1, 8], strides = [1, 1]} : vector<1x128xf32> to vector<1x8xf32>
    %25 = math.exp %24 : vector<1x8xf32>
    %26 = vector.extract_strided_slice %25 {offsets = [0, 0], sizes = [1, 4], strides = [1, 1]} : vector<1x8xf32> to vector<1x4xf32>
    %27 = vector.extract_strided_slice %25 {offsets = [0, 4], sizes = [1, 4], strides = [1, 1]} : vector<1x8xf32> to vector<1x4xf32>
    %28 = vector.extract_strided_slice %23 {offsets = [0, 8], sizes = [1, 4], strides = [1, 1]} : vector<1x128xf32> to vector<1x4xf32>
    %cst_22 = arith.constant dense<0.000000e+00> : vector<1xf32>
    %29 = vector.multi_reduction <add>, %28, %cst_22 [1] : vector<1x4xf32> to vector<1xf32>
    %30 = vector.shape_cast %29 : vector<1xf32> to vector<1x1xf32>
    %31 = vector.broadcast %30 : vector<1x1xf32> to vector<1x4xf32>
    %32 = arith.divf %28, %31 : vector<1x4xf32>
    %33 = vector.extract_strided_slice %23 {offsets = [0, 12], sizes = [1, 4], strides = [1, 1]} : vector<1x128xf32> to vector<1x4xf32>
    %34 = vector.extract_strided_slice %23 {offsets = [0, 16], sizes = [1, 4], strides = [1, 1]} : vector<1x128xf32> to vector<1x4xf32>
    %35 = vector.extract_strided_slice %22 {offsets = [0, 0], sizes = [8, 4], strides = [1, 1]} : vector<8x128xf32> to vector<8x4xf32>
    %36 = vector.extract_strided_slice %22 {offsets = [0, 4], sizes = [8, 4], strides = [1, 1]} : vector<8x128xf32> to vector<8x4xf32>
    %37 = vector.broadcast %26 : vector<1x4xf32> to vector<8x4xf32>
    %38 = arith.mulf %37, %35 : vector<8x4xf32>
    %39 = vector.broadcast %27 : vector<1x4xf32> to vector<8x4xf32>
    %40 = arith.mulf %39, %36 : vector<8x4xf32>
    %41 = arith.subf %40, %38 : vector<8x4xf32>
    %42 = math.absf %41 : vector<8x4xf32>
    %cst_23 = arith.constant 0.000000e+00 : f32
    %43 = vector.broadcast %cst_23 : f32 to vector<8x4xf32>
    %44 = arith.subf %43, %42 : vector<8x4xf32>
    %45 = math.exp %44 : vector<8x4xf32>
    %cst_24 = arith.constant 1.000000e+00 : f32
    %46 = vector.broadcast %cst_24 : f32 to vector<8x4xf32>
    %47 = arith.addf %46, %45 : vector<8x4xf32>
    %cst_25 = arith.constant 1.000000e+00 : f32
    %48 = vector.broadcast %cst_25 : f32 to vector<8x4xf32>
    %49 = arith.divf %48, %47 : vector<8x4xf32>
    %cst_26 = arith.constant 0.000000e+00 : f32
    %50 = vector.broadcast %cst_26 : f32 to vector<8x4xf32>
    %51 = arith.cmpf oge, %41, %50 : vector<8x4xf32>
    %cst_27 = arith.constant 1.000000e+00 : f32
    %52 = vector.broadcast %cst_27 : f32 to vector<8x4xf32>
    %53 = arith.subf %52, %49 : vector<8x4xf32>
    %54 = arith.select %51, %49, %53 : vector<8x4xi1>, vector<8x4xf32>
    %cst_28 = arith.constant 1.000000e+00 : f32
    %55 = vector.broadcast %cst_28 : f32 to vector<8x4xf32>
    %56 = arith.subf %55, %54 : vector<8x4xf32>
    %c8_i32 = arith.constant 8 : i32
    %57 = arith.muli %arg0, %c8_i32 : i32
    %58 = tpu.iota {dimensions = array<i32: 0>} : vector<8x4xi32>
    %59 = vector.broadcast %57 : i32 to vector<8x4xi32>
    %60 = arith.addi %59, %58 : vector<8x4xi32>
    %61 = tpu.iota {dimensions = array<i32: 1>} : vector<8x4xi32>
    %62 = arith.addi %60, %61 : vector<8x4xi32>
    %c3_i32 = arith.constant 3 : i32
    %63 = vector.broadcast %c3_i32 : i32 to vector<8x4xi32>
    %64 = arith.cmpi sge, %62, %63 : vector<8x4xi32>
    %65 = arith.extui %64 : vector<8x4xi1> to vector<8x4xi32>
    %66 = arith.sitofp %65 : vector<8x4xi32> to vector<8x4xf32>
    %67 = vector.broadcast %32 : vector<1x4xf32> to vector<8x4xf32>
    %68 = arith.mulf %67, %56 : vector<8x4xf32>
    %69 = arith.mulf %68, %66 : vector<8x4xf32>
    %70 = vector.broadcast %32 : vector<1x4xf32> to vector<8x4xf32>
    %71 = arith.mulf %70, %54 : vector<8x4xf32>
    %72 = arith.mulf %71, %66 : vector<8x4xf32>
    %cst_29 = arith.constant dense<0.000000e+00> : vector<8xf32>
    %73 = vector.multi_reduction <add>, %69, %cst_29 [1] : vector<8x4xf32> to vector<8xf32>
    %74 = vector.shape_cast %73 : vector<8xf32> to vector<8x1xf32>
    %cst_30 = arith.constant dense<0.000000e+00> : vector<8xf32>
    %75 = vector.multi_reduction <add>, %72, %cst_30 [1] : vector<8x4xf32> to vector<8xf32>
    %76 = vector.shape_cast %75 : vector<8xf32> to vector<8x1xf32>
    %77 = arith.subf %72, %69 : vector<8x4xf32>
    %78 = vector.broadcast %33 : vector<1x4xf32> to vector<8x4xf32>
    %79 = arith.mulf %77, %78 : vector<8x4xf32>
    %cst_31 = arith.constant dense<0.000000e+00> : vector<8xf32>
    %80 = vector.multi_reduction <add>, %79, %cst_31 [1] : vector<8x4xf32> to vector<8xf32>
    %81 = vector.shape_cast %80 : vector<8xf32> to vector<8x1xf32>
    %82 = vector.broadcast %34 : vector<1x4xf32> to vector<8x4xf32>
    %83 = arith.mulf %77, %82 : vector<8x4xf32>
    %cst_32 = arith.constant dense<0.000000e+00> : vector<8xf32>
    %84 = vector.multi_reduction <add>, %83, %cst_32 [1] : vector<8x4xf32> to vector<8xf32>
    %85 = vector.shape_cast %84 : vector<8xf32> to vector<8x1xf32>
    %c8_i32_33 = arith.constant 8 : i32
    %86 = arith.muli %arg0, %c8_i32_33 : i32
    %87 = tpu.iota {dimensions = array<i32: 0>} : vector<8x1xi32>
    %88 = vector.broadcast %86 : i32 to vector<8x1xi32>
    %89 = arith.addi %88, %87 : vector<8x1xi32>
    %c16_i32 = arith.constant 16 : i32
    %90 = vector.broadcast %c16_i32 : i32 to vector<8x1xi32>
    %91 = arith.cmpi slt, %89, %90 : vector<8x1xi32>
    %92 = arith.extui %91 : vector<8x1xi1> to vector<8x1xi32>
    %93 = arith.sitofp %92 : vector<8x1xi32> to vector<8x1xf32>
    %94 = vector.extract_strided_slice %0 {offsets = [0, 8], sizes = [8, 1], strides = [1, 1]} : vector<8x128xf32> to vector<8x1xf32>
    %95 = arith.subf %81, %94 : vector<8x1xf32>
    %96 = vector.extract_strided_slice %0 {offsets = [0, 9], sizes = [8, 1], strides = [1, 1]} : vector<8x128xf32> to vector<8x1xf32>
    %97 = arith.subf %85, %96 : vector<8x1xf32>
    %98 = arith.mulf %95, %95 : vector<8x1xf32>
    %99 = arith.mulf %97, %97 : vector<8x1xf32>
    %100 = arith.addf %98, %99 : vector<8x1xf32>
    %101 = arith.mulf %100, %93 : vector<8x1xf32>
    %cst_34 = arith.constant dense<0.000000e+00> : vector<1xf32>
    %102 = vector.multi_reduction <add>, %101, %cst_34 [0] : vector<8x1xf32> to vector<1xf32>
    %103 = vector.shape_cast %102 : vector<1xf32> to vector<1x1xf32>
    %c3_i32_35 = arith.constant 3 : i32
    %104 = vector.broadcast %c3_i32_35 : i32 to vector<8x1xi32>
    %105 = arith.cmpi sge, %89, %104 : vector<8x1xi32>
    %c6_i32 = arith.constant 6 : i32
    %106 = vector.broadcast %c6_i32 : i32 to vector<8x1xi32>
    %107 = arith.cmpi slt, %89, %106 : vector<8x1xi32>
    %108 = arith.andi %105, %107 : vector<8x1xi1>
    %109 = vector.extract_strided_slice %0 {offsets = [0, 10], sizes = [8, 1], strides = [1, 1]} : vector<8x128xf32> to vector<8x1xf32>
    %cst_36 = arith.constant 0.000000e+00 : f32
    %110 = vector.broadcast %cst_36 : f32 to vector<8x1xf32>
    %111 = arith.cmpf oge, %109, %110 : vector<8x1xf32>
    %112 = arith.extui %111 : vector<8x1xi1> to vector<8x1xi32>
    %113 = arith.sitofp %112 : vector<8x1xi32> to vector<8x1xf32>
    %cst_37 = arith.constant 1.000000e+00 : f32
    %114 = vector.broadcast %cst_37 : f32 to vector<8x1xf32>
    %115 = arith.select %108, %74, %114 : vector<8x1xi1>, vector<8x1xf32>
    %cst_38 = arith.constant 1.000000e+00 : f32
    %116 = vector.broadcast %cst_38 : f32 to vector<8x1xf32>
    %117 = arith.select %108, %76, %116 : vector<8x1xi1>, vector<8x1xf32>
    %118 = math.log %117 : vector<8x1xf32>
    %119 = arith.mulf %113, %118 : vector<8x1xf32>
    %cst_39 = arith.constant 1.000000e+00 : f32
    %120 = vector.broadcast %cst_39 : f32 to vector<8x1xf32>
    %121 = arith.subf %120, %113 : vector<8x1xf32>
    %122 = math.log %115 : vector<8x1xf32>
    %123 = arith.mulf %121, %122 : vector<8x1xf32>
    %124 = arith.addf %119, %123 : vector<8x1xf32>
    %cst_40 = arith.constant dense<0.000000e+00> : vector<1xf32>
    %125 = vector.multi_reduction <add>, %124, %cst_40 [0] : vector<8x1xf32> to vector<1xf32>
    %126 = vector.shape_cast %125 : vector<1xf32> to vector<1x1xf32>
    %127 = tpu.iota {dimensions = array<i32: 1>} : vector<8x128xi32>
    %c8_i32_41 = arith.constant 8 : i32
    %128 = vector.broadcast %c8_i32_41 : i32 to vector<8x128xi32>
    %129 = arith.cmpi eq, %127, %128 : vector<8x128xi32>
    %130 = vector.shape_cast %74 : vector<8x1xf32> to vector<8x1xf32>
    %131 = vector.broadcast %130 : vector<8x1xf32> to vector<8x128xf32>
    %132 = arith.select %129, %131, %22 : vector<8x128xi1>, vector<8x128xf32>
    %c9_i32 = arith.constant 9 : i32
    %133 = vector.broadcast %c9_i32 : i32 to vector<8x128xi32>
    %134 = arith.cmpi eq, %127, %133 : vector<8x128xi32>
    %135 = vector.shape_cast %76 : vector<8x1xf32> to vector<8x1xf32>
    %136 = vector.broadcast %135 : vector<8x1xf32> to vector<8x128xf32>
    %137 = arith.select %134, %136, %132 : vector<8x128xi1>, vector<8x128xf32>
    %c10_i32 = arith.constant 10 : i32
    %138 = vector.broadcast %c10_i32 : i32 to vector<8x128xi32>
    %139 = arith.cmpi eq, %127, %138 : vector<8x128xi32>
    %140 = vector.shape_cast %81 : vector<8x1xf32> to vector<8x1xf32>
    %141 = vector.broadcast %140 : vector<8x1xf32> to vector<8x128xf32>
    %142 = arith.select %139, %141, %137 : vector<8x128xi1>, vector<8x128xf32>
    %c11_i32 = arith.constant 11 : i32
    %143 = vector.broadcast %c11_i32 : i32 to vector<8x128xi32>
    %144 = arith.cmpi eq, %127, %143 : vector<8x128xi32>
    %145 = vector.shape_cast %85 : vector<8x1xf32> to vector<8x1xf32>
    %146 = vector.broadcast %145 : vector<8x1xf32> to vector<8x128xf32>
    %147 = arith.select %144, %146, %142 : vector<8x128xi1>, vector<8x128xf32>
    %c12_i32 = arith.constant 12 : i32
    %148 = vector.broadcast %c12_i32 : i32 to vector<8x128xi32>
    %149 = arith.cmpi eq, %127, %148 : vector<8x128xi32>
    %150 = vector.shape_cast %103 : vector<1x1xf32> to vector<1x1xf32>
    %151 = vector.broadcast %150 : vector<1x1xf32> to vector<8x128xf32>
    %152 = arith.select %149, %151, %147 : vector<8x128xi1>, vector<8x128xf32>
    %c13_i32 = arith.constant 13 : i32
    %153 = vector.broadcast %c13_i32 : i32 to vector<8x128xi32>
    %154 = arith.cmpi eq, %127, %153 : vector<8x128xi32>
    %155 = vector.shape_cast %126 : vector<1x1xf32> to vector<1x1xf32>
    %156 = vector.broadcast %155 : vector<1x1xf32> to vector<8x128xf32>
    %157 = arith.select %154, %156, %152 : vector<8x128xi1>, vector<8x128xf32>
    %c0_42 = arith.constant 0 : index
    %c0_43 = arith.constant 0 : index
    %158 = vector.load %arg5[%c0_42, %c0_43] : memref<8x128xf32, #tpu.memory_space<vmem>>, vector<8x128xf32>
    tpu.vector_store %arg5[%c0_42, %c0_43], %157 {strides = array<i32>} : memref<8x128xf32, #tpu.memory_space<vmem>>, vector<8x128xf32>,
    return
  }
  func.func @transform_0(%arg0: i32) -> (i32, i32) {
    %c0_i32 = arith.constant 0 : i32
    %c0_i32_0 = arith.constant 0 : i32
    return %arg0, %c0_i32 : i32, i32
  }
  func.func @transform_1(%arg0: i32) -> (i32, i32) {
    %c0_i32 = arith.constant 0 : i32
    %c0_i32_0 = arith.constant 0 : i32
    %c0_i32_1 = arith.constant 0 : i32
    return %c0_i32, %c0_i32_0 : i32, i32
  }
  func.func @transform_2(%arg0: i32) -> (i32, i32) {
    %c0_i32 = arith.constant 0 : i32
    %c0_i32_0 = arith.constant 0 : i32
    %c0_i32_1 = arith.constant 0 : i32
    return %c0_i32, %c0_i32_0 : i32, i32
  }
  func.func @transform_3(%arg0: i32) -> (i32, i32) {
    %c0_i32 = arith.constant 0 : i32
    %c0_i32_0 = arith.constant 0 : i32
    %c0_i32_1 = arith.constant 0 : i32
    return %c0_i32, %c0_i32_0 : i32, i32
  }
  func.func @transform_4(%arg0: i32) -> (i32, i32) {
    %c0_i32 = arith.constant 0 : i32
    %c0_i32_0 = arith.constant 0 : i32
    return %arg0, %c0_i32 : i32, i32
  }
}

</mosaic_0001>

<bundles_post_ra>
// kernel: custom-call.1
= control target key start
LH: loop header
LB: loop body
LE: loop exit
PB: predicated region body
PF: predicated region fallthrough
CT: control target
= control target key end

     0   :  { %s56_s0 = inlined_call_operand.hbm [shape: c64[16,4], index: 0, kind: input, shape index: {}]   ;;  %s57_s1 = inlined_call_operand.vmem [shape: f32[16,4], index: 1, kind: output, shape index: {}]  }
   0x1   :  { %s2_s8 = scalar_lea.hbm %s56_s0, 4 }
   0x2   :  { %3 = vsyncpa [#allocation0], 0  ;;  %s5_s9 = sshll.u32 %s2_s8, 4  ;;  %s7_s12 = sshll.u32 %s57_s1, 4  ;;  %s6_s9 = int_to_ptr.hbm [resolvable:$true] %s5_s9  ;;  %s8_s12 = int_to_ptr.vmem [resolvable:$true] %s7_s12 }
   0x3   :  { %10 = dma.hbm_to_vmem [thread:$0]  %s6_s9, 64, %s8_s12, [#allocation0] }
   0x4   :  { %38 = dma.done.wait [#allocation0], 64  }
   0x5   :  { %39 = vsyncadd [#allocation0], 4294967232 }
   0x6   :  { %13 = vsyncpa [#allocation0], 1 }

// kernel: custom-call
= control target key start
LH: loop header
LB: loop body
LE: loop exit
PB: predicated region body
PF: predicated region fallthrough
CT: control target
= control target key end

     0   :  { %2 = vsyncpa [#allocation0], 0  ;;  %s55_s0 = inlined_call_operand.hbm [shape: c64[16,4], index: 0, kind: input, shape index: {}]   ;;  %s56_s1 = inlined_call_operand.vmem [shape: f32[16,4], index: 1, kind: output, shape index: {}]  }
   0x1   :  { %s4_s8 = sshll.u32 %s55_s0, 4  ;;  %s6_s11 = sshll.u32 %s56_s1, 4  ;;  %s5_s8 = int_to_ptr.hbm [resolvable:$true] %s4_s8  ;;  %s7_s11 = int_to_ptr.vmem [resolvable:$true] %s6_s11 }
   0x2   :  { %9 = dma.hbm_to_vmem [thread:$0]  %s5_s8, 64, %s7_s11, [#allocation0] }
   0x3   :  { %37 = dma.done.wait [#allocation0], 64  }
   0x4   :  { %38 = vsyncadd [#allocation0], 4294967232 }
   0x5   :  { %12 = vsyncpa [#allocation0], 1 }

// kernel: custom-call.2
= control target key start
LH: loop header
LB: loop body
LE: loop exit
PB: predicated region body
PF: predicated region fallthrough
CT: control target
= control target key end

     0   :  { %2 = vsyncpa [#allocation0], 0  ;;  %s55_s0 = inlined_call_operand.hbm [shape: c64[16], index: 0, kind: input, shape index: {}]   ;;  %s56_s1 = inlined_call_operand.vmem [shape: f32[16], index: 1, kind: output, shape index: {}]  }
   0x1   :  { %s4_s8 = sshll.u32 %s55_s0, 4  ;;  %s6_s11 = sshll.u32 %s56_s1, 4  ;;  %s5_s8 = int_to_ptr.hbm [resolvable:$true] %s4_s8  ;;  %s7_s11 = int_to_ptr.vmem [resolvable:$true] %s6_s11 }
   0x2   :  { %9 = dma.hbm_to_vmem [thread:$0]  %s5_s8, 16, %s7_s11, [#allocation0] }
   0x3   :  { %37 = dma.done.wait [#allocation0], 16  }
   0x4   :  { %38 = vsyncadd [#allocation0], 4294967280 }
   0x5   :  { %12 = vsyncpa [#allocation0], 1 }

// kernel: custom-call.3
= control target key start
LH: loop header
LB: loop body
LE: loop exit
PB: predicated region body
PF: predicated region fallthrough
CT: control target
= control target key end

     0   :  { %s56_s0 = inlined_call_operand.hbm [shape: c64[16], index: 0, kind: input, shape index: {}]   ;;  %s57_s1 = inlined_call_operand.vmem [shape: f32[16], index: 1, kind: output, shape index: {}]  }
   0x1   :  { %s2_s8 = scalar_lea.hbm %s56_s0, 1 }
   0x2   :  { %3 = vsyncpa [#allocation0], 0  ;;  %s5_s9 = sshll.u32 %s2_s8, 4  ;;  %s7_s12 = sshll.u32 %s57_s1, 4  ;;  %s6_s9 = int_to_ptr.hbm [resolvable:$true] %s5_s9  ;;  %s8_s12 = int_to_ptr.vmem [resolvable:$true] %s7_s12 }
   0x3   :  { %10 = dma.hbm_to_vmem [thread:$0]  %s6_s9, 16, %s8_s12, [#allocation0] }
   0x4   :  { %38 = dma.done.wait [#allocation0], 16  }
   0x5   :  { %39 = vsyncadd [#allocation0], 4294967280 }
   0x6   :  { %13 = vsyncpa [#allocation0], 1 }

// kernel: custom-call.4
= control target key start
LH: loop header
LB: loop body
LE: loop exit
PB: predicated region body
PF: predicated region fallthrough
CT: control target
= control target key end

     0   :  { %vm3_vm0 = vcmask 1043456   ;;  %s21_s0 = inlined_call_operand.vmem [shape: c64[3,2], index: 0, kind: input, shape index: {}]   ;;  %s22_s1 = inlined_call_operand.vmem [shape: f32[3,2], index: 1, kind: output, shape index: {}]  }
   0x1   :  { %v2_v0 = vld [vmem:[%s21_s0] sm:$0xf] }
   0x2   :  { %4 = vst.msk [vmem:[%s22_s1] sm:$0xff] %vm3_vm0, %v2_v0 }

// kernel: custom-call.7
= control target key start
LH: loop header
LB: loop body
LE: loop exit
PB: predicated region body
PF: predicated region fallthrough
CT: control target
= control target key end

     0   :  { %s56_s0 = inlined_call_operand.hbm [shape: c64[2,4], index: 0, kind: input, shape index: {}]   ;;  %s57_s1 = inlined_call_operand.vmem [shape: f32[2,4], index: 1, kind: output, shape index: {}]  }
   0x1   :  { %s2_s8 = scalar_lea.hbm %s56_s0, 2 }
   0x2   :  { %3 = vsyncpa [#allocation0], 0  ;;  %s5_s9 = sshll.u32 %s2_s8, 4  ;;  %s7_s12 = sshll.u32 %s57_s1, 4  ;;  %s6_s9 = int_to_ptr.hbm [resolvable:$true] %s5_s9  ;;  %s8_s12 = int_to_ptr.vmem [resolvable:$true] %s7_s12 }
   0x3   :  { %10 = dma.hbm_to_vmem [thread:$0]  %s6_s9, 32, %s8_s12, [#allocation0] }
   0x4   :  { %38 = dma.done.wait [#allocation0], 32  }
   0x5   :  { %39 = vsyncadd [#allocation0], 4294967264 }
   0x6   :  { %13 = vsyncpa [#allocation0], 1 }

// kernel: custom-call.6
= control target key start
LH: loop header
LB: loop body
LE: loop exit
PB: predicated region body
PF: predicated region fallthrough
CT: control target
= control target key end

     0   :  { %2 = vsyncpa [#allocation0], 0  ;;  %s55_s0 = inlined_call_operand.hbm [shape: c64[2,4], index: 0, kind: input, shape index: {}]   ;;  %s56_s1 = inlined_call_operand.vmem [shape: f32[2,4], index: 1, kind: output, shape index: {}]  }
   0x1   :  { %s4_s8 = sshll.u32 %s55_s0, 4  ;;  %s6_s11 = sshll.u32 %s56_s1, 4  ;;  %s5_s8 = int_to_ptr.hbm [resolvable:$true] %s4_s8  ;;  %s7_s11 = int_to_ptr.vmem [resolvable:$true] %s6_s11 }
   0x2   :  { %9 = dma.hbm_to_vmem [thread:$0]  %s5_s8, 32, %s7_s11, [#allocation0] }
   0x3   :  { %37 = dma.done.wait [#allocation0], 32  }
   0x4   :  { %38 = vsyncadd [#allocation0], 4294967264 }
   0x5   :  { %12 = vsyncpa [#allocation0], 1 }

// kernel: naive_forward.1
= control target key start
LH: loop header
LB: loop body
LE: loop exit
PB: predicated region body
PF: predicated region fallthrough
CT: control target
= control target key end

     0   :  { %9 = vsyncpa [#allocation3], 0  ;;  %s1450_s0 = inlined_call_operand.vmem [shape: f32[16,128], index: 0, kind: input, shape index: {}]   ;;  %s1451_s1 = inlined_call_operand.hbm [shape: f32[768,128], index: 1, kind: input, shape index: {}]   ;;  %s1452_s2 = inlined_call_operand.hbm [shape: f32[512,384], index: 2, kind: input, shape index: {}]   ;;  %s1453_s3 = inlined_call_operand.vmem [shape: f32[1,128], index: 3, kind: input, shape index: {}]   ;;  %s1454_s4 = inlined_call_operand.vmem [shape: f32[16,128], index: 4, kind: output, shape index: {}]  }
   0x1   :  { %10 = vsyncpa [#allocation5], 0  ;;  %s1342_s15 = smov 0  }
   0x2 LB: > { %s147_s18 = sshll.u32 %s1451_s1, 4  ;;  %s1351_s19 = sadd.s32 4294967295, %s1301_s15   ;;  %s1301_s15 = sphi %s1342_s15, %s16_s15   ;;  %s148_s18 = int_to_ptr.hbm [resolvable:$true] %s147_s18 }
   0x3   : > { %p1155_p0 = scmp.ge.s32.totalorder %s1301_s15, 1  ;;  %p136_p1 = scmp.lt.s32.totalorder %s1301_s15, 3 }
   0x4   : > { %p1185_p2 = scmp.eq.s32.totalorder %s1351_s19, 0  ;;  %s1303_s21 = smov [#allocation2]  }
   0x5   : > { %p1356_p3 = pnand %p1155_p0, %p136_p1  ;;  %s149_s22 = sshll.u32 %s1303_s21, 4  ;;  %s150_s22 = int_to_ptr.vmem [resolvable:$true] %s149_s22 }
   0x6   : > { %s161_s25 = sshll.u32 %s1452_s2, 4  ;;  %s1304_s26 = smov [#allocation4]   ;;  %s162_s25 = int_to_ptr.hbm [resolvable:$true] %s161_s25 }
   0x7   : > { %p1178_p4 = pneg %p1356_p3  ;;  %s163_s27 = sshll.u32 %s1304_s26, 4  ;;  %s164_s27 = int_to_ptr.vmem [resolvable:$true] %s163_s27 }
   0x8   : > { %s1305_s28 = smov 128   ;;  %s1306_s29 = smov 8  }
   0x9   : > { %p1179_p5 = pnand %p1185_p2, %p1178_p4  ;;  %s1307_s30 = smov 384  }
   0xa   : > { %s1308_s5 = smov 24   ;;  %189 = sbr.rel (%p1356_p3) target bundleno = 1575 (0x627), region = 36 }
   0xb   : > { %1181 = dma.hbm_to_vmem [thread:$0]  (!%p1179_p5), %s148_s18, 12288, %s150_s22, [#allocation3], %s1305_s28, %s1305_s28, %s1306_s29  }
   0xc   : > { %1184 = dma.hbm_to_vmem [thread:$0]  (!%p1179_p5), %s162_s25, 24576, %s164_s27, [#allocation5], %s1307_s30, %s1307_s30, %s1308_s5  }
   0xf   : > { %1292 = dma.done.wait (%p1185_p2), [#allocation3], 12288  }
  0x10   : > { %1294 = vsyncadd (%p1185_p2), [#allocation3], 4294955008 }
  0x11   : > { %1296 = dma.done.wait (%p1185_p2), [#allocation5], 24576  }
  0x12   : > { %1298 = vsyncadd (%p1185_p2), [#allocation5], 4294942720  ;;  %v243_v0 = vld [vmem:[#allocation2 + $0x78] sm:$0xff]  ;;  %v242_v1 = vld [vmem:[#allocation2 + $0x70] sm:$0xff]  ;;  %p219_p6 = scmp.lt.s32.totalorder %s1351_s19, 1  ;;  %s1309_s13 = smov 4  }
  0x13   : > { %244 = vmatpush.msra.mxu0 %v243_v0  ;;  %v241_v2 = vld [vmem:[#allocation2 + $0x68] sm:$0xff]  ;;  %v240_v3 = vld [vmem:[#allocation2 + $0x60] sm:$0xff]  ;;  %v239_v4 = vld [vmem:[#allocation2 + $0x58] sm:$0xff]  ;;  %s1310_s17 = smov 120   ;;  %s1311_s18 = smov 124   ;;  %vm893_vm0 = vcmask 24576  }
  0x14   : > { %v310_v5 = vld [vmem:[#allocation4 + $0x168] sm:$0xff]  ;;  %v311_v6 = vld [vmem:[#allocation4 + $0x170] sm:$0xff]  ;;  %v312_v7 = vld [vmem:[#allocation4 + $0x178] sm:$0xff]  ;;  %s1381_s6 = scalar_select %p219_p6, %s1351_s19, 1  ;;  %vm979_vm11 = vcmask 31744  }
  0x15   : > { %245 = vmatpush.msra.mxu0 %v242_v1  ;;  %313 = vmatpush.msra.mxu1 %v310_v5  ;;  %v307_v8 = vld [vmem:[#allocation4 + $0x150] sm:$0xff]  ;;  %v308_v9 = vld [vmem:[#allocation4 + $0x158] sm:$0xff]  ;;  %v309_v10 = vld [vmem:[#allocation4 + $0x160] sm:$0xff]  ;;  %s1164_s20 = sshll.u32 %s1351_s19, 3  ;;  %s1313_s19 = smov 8  }
  0x16   : > { %333 = vmatpush.msra.mxu2 %v311_v6  ;;  %v304_v11 = vld [vmem:[#allocation4 + $0x138] sm:$0xff]  ;;  %v238_v12 = vld [vmem:[#allocation2 + $0x50] sm:$0xff]  ;;  %353 = vmatpush.msra.mxu3 %v312_v7  ;;  %v305_v13 = vld [vmem:[#allocation4 + $0x140] sm:$0xff]  ;;  %s1162_s7 = sshll.u32 %s1381_s6, 3  ;;  %s1315_s21 = smov 127  }
  0x17   : > { %246 = vmatpush.msra.mxu0 %v241_v2  ;;  %314 = vmatpush.msra.mxu1 %v307_v8  ;;  %v306_v14 = vld [vmem:[#allocation4 + $0x148] sm:$0xff]  ;;  %v301_v15 = vld [vmem:[#allocation4 + $0x120] sm:$0xff]  ;;  %v303_v18 = vld [vmem:[#allocation4 + $0x130] sm:$0xff]  ;;  %s1389_s10 = scalar_lea.vmem %s1450_s0, %s1162_s7  ;;  %s226_s24 = scalar_lea.vmem %s1454_s4, %s1162_s7 }
  0x18   : > { %334 = vmatpush.msra.mxu2 %v308_v9  ;;  %v237_v16 = vld [vmem:[#allocation2 + $0x48] sm:$0xff]  ;;  %354 = vmatpush.msra.mxu3 %v309_v10  ;;  %v236_v20 = vld [vmem:[#allocation2 + $0x40] sm:$0xff]  ;;  %v299_v21 = vld [vmem:[#allocation4 + $0x110] sm:$0xff] }
  0x19   : > { %247 = vmatpush.msra.mxu0 %v240_v3  ;;  %315 = vmatpush.msra.mxu1 %v304_v11  ;;  %v302_v17 = vld [vmem:[#allocation4 + $0x128] sm:$0xff]  ;;  %v300_v22 = vld [vmem:[#allocation4 + $0x118] sm:$0xff]  ;;  %v295_v23 = vld [vmem:[#allocation4 + $0xf0] sm:$0xff] }
  0x1a   : > { %335 = vmatpush.msra.mxu2 %v305_v13  ;;  %v298_v19 = vld [vmem:[#allocation4 + $0x108] sm:$0xff]  ;;  %355 = vmatpush.msra.mxu3 %v306_v14  ;;  %v235_v24 = vld [vmem:[#allocation2 + $0x38] sm:$0xff]  ;;  %v297_v26 = vld [vmem:[#allocation4 + $0x100] sm:$0xff] }
  0x1b   : > { %248 = vmatpush.msra.mxu0 %v239_v4  ;;  %316 = vmatpush.msra.mxu1 %v301_v15  ;;  %v296_v25 = vld [vmem:[#allocation4 + $0xf8] sm:$0xff]  ;;  %v234_v28 = vld [vmem:[#allocation2 + $0x30] sm:$0xff]  ;;  %v293_v29 = vld [vmem:[#allocation4 + $0xe0] sm:$0xff] }
  0x1c   : > { %336 = vmatpush.msra.mxu2 %v302_v17  ;;  %356 = vmatpush.msra.mxu3 %v303_v18  ;;  %v292_v27 = vld [vmem:[#allocation4 + $0xd8] sm:$0xff]  ;;  %v294_v30 = vld [vmem:[#allocation4 + $0xe8] sm:$0xff]  ;;  %v289_v31 = vld [vmem:[#allocation4 + $0xc0] sm:$0xff] }
  0x1d   : > { %249 = vmatpush.msra.mxu0 %v238_v12  ;;  %317 = vmatpush.msra.mxu1 %v298_v19  ;;  %v233_v32 = vld [vmem:[#allocation2 + $0x28] sm:$0xff]  ;;  %v291_v34 = vld [vmem:[#allocation4 + $0xd0] sm:$0xff]  ;;  %v232_v36 = vld [vmem:[#allocation2 + $0x20] sm:$0xff] }
  0x1e   : > { %337 = vmatpush.msra.mxu2 %v299_v21  ;;  %357 = vmatpush.msra.mxu3 %v300_v22  ;;  %v290_v33 = vld [vmem:[#allocation4 + $0xc8] sm:$0xff]  ;;  %v287_v37 = vld [vmem:[#allocation4 + $0xb0] sm:$0xff]  ;;  %v288_v38 = vld [vmem:[#allocation4 + $0xb8] sm:$0xff] }
  0x1f   : > { %250 = vmatpush.msra.mxu0 %v237_v16  ;;  %318 = vmatpush.msra.mxu1 %v295_v23  ;;  %v286_v35 = vld [vmem:[#allocation4 + $0xa8] sm:$0xff]  ;;  %v283_v39 = vld [vmem:[#allocation4 + $0x90] sm:$0xff]  ;;  %v231_v40 = vld [vmem:[#allocation2 + $0x18] sm:$0xff] }
  0x20   : > { %338 = vmatpush.msra.mxu2 %v296_v25  ;;  %358 = vmatpush.msra.mxu3 %v297_v26  ;;  %v284_v41 = vld [vmem:[#allocation4 + $0x98] sm:$0xff]  ;;  %v285_v42 = vld [vmem:[#allocation4 + $0xa0] sm:$0xff]  ;;  %v230_v44 = vld [vmem:[#allocation2 + $0x10] sm:$0xff] }
  0x21   : > { %251 = vmatpush.msra.mxu0 %v236_v20  ;;  %319 = vmatpush.msra.mxu1 %v292_v27  ;;  %v280_v43 = vld [vmem:[#allocation4 + $0x78] sm:$0xff]  ;;  %v281_v45 = vld [vmem:[#allocation4 + $0x80] sm:$0xff]  ;;  %v282_v46 = vld [vmem:[#allocation4 + $0x88] sm:$0xff] }
  0x22   : > { %339 = vmatpush.msra.mxu2 %v293_v29  ;;  %359 = vmatpush.msra.mxu3 %v294_v30  ;;  %v277_v47 = vld [vmem:[#allocation4 + $0x60] sm:$0xff]  ;;  %v229_v48 = vld [vmem:[#allocation2 + $0x8] sm:$0xff]  ;;  %v279_v50 = vld [vmem:[#allocation4 + $0x70] sm:$0xff] }
  0x23   : > { %252 = vmatpush.msra.mxu0 %v235_v24  ;;  %320 = vmatpush.msra.mxu1 %v289_v31  ;;  %v278_v49 = vld [vmem:[#allocation4 + $0x68] sm:$0xff]  ;;  %v228_v52 = vld [vmem:[#allocation2] sm:$0xff]  ;;  %v275_v53 = vld [vmem:[#allocation4 + $0x50] sm:$0xff] }
  0x24   : > { %340 = vmatpush.msra.mxu2 %v290_v33  ;;  %360 = vmatpush.msra.mxu3 %v291_v34  ;;  %v274_v51 = vld [vmem:[#allocation4 + $0x48] sm:$0xff]  ;;  %v227_v54 = vld [vmem:[%s1389_s10] sm:$0xff]  ;;  %v276_v55 = vld [vmem:[#allocation4 + $0x58] sm:$0xff] }
  0x25   : > { %253 = vmatpush.msra.mxu0 %v234_v28  ;;  %321 = vmatpush.msra.mxu1 %v286_v35  ;;  %v271_v56 = vld [vmem:[#allocation4 + $0x30] sm:$0xff]  ;;  %v272_v57 = vld [vmem:[#allocation4 + $0x38] sm:$0xff]  ;;  %v273_v58 = vld [vmem:[#allocation4 + $0x40] sm:$0xff] }
  0x26   : > { %341 = vmatpush.msra.mxu2 %v287_v37  ;;  %361 = vmatpush.msra.mxu3 %v288_v38  ;;  %v268_v59 = vld [vmem:[#allocation4 + $0x18] sm:$0xff]  ;;  %v269_v60 = vld [vmem:[#allocation4 + $0x20] sm:$0xff]  ;;  %v270_v61 = vld [vmem:[#allocation4 + $0x28] sm:$0xff] }
  0x27   : > { %254 = vmatpush.msra.mxu0 %v233_v32  ;;  %322 = vmatpush.msra.mxu1 %v283_v39  ;;  %v265_v62 = vld [vmem:[#allocation4] sm:$0xff]  ;;  %v266_v63 = vld [vmem:[#allocation4 + $0x8] sm:$0xff]  ;;  %v267_v0 = vld [vmem:[#allocation4 + $0x10] sm:$0xff] }
  0x28   : > { %342 = vmatpush.msra.mxu2 %v284_v41  ;;  %362 = vmatpush.msra.mxu3 %v285_v42  ;;  %v421_v1 = vld [vmem:[#allocation4 + $0x2e8] sm:$0xff]  ;;  %v418_v2 = vld [vmem:[#allocation4 + $0x2d0] sm:$0xff]  ;;  %v415_v4 = vld [vmem:[#allocation4 + $0x2b8] sm:$0xff] }
  0x29   : > { %255 = vmatpush.msra.mxu0 %v232_v36  ;;  %323 = vmatpush.msra.mxu1 %v280_v43  ;;  %v422_v3 = vld [vmem:[#allocation4 + $0x2f0] sm:$0xff]  ;;  %v419_v5 = vld [vmem:[#allocation4 + $0x2d8] sm:$0xff]  ;;  %v416_v6 = vld [vmem:[#allocation4 + $0x2c0] sm:$0xff] }
  0x2a   : > { %343 = vmatpush.msra.mxu2 %v281_v45  ;;  %363 = vmatpush.msra.mxu3 %v282_v46  ;;  %v469_v7 = vld [vmem:[#allocation4 + $0x468] sm:$0xff]  ;;  %v412_v8 = vld [vmem:[#allocation4 + $0x2a0] sm:$0xff]  ;;  %v466_v11 = vld [vmem:[#allocation4 + $0x450] sm:$0xff] }
  0x2b   : > { %256 = vmatpush.msra.mxu0 %v231_v40  ;;  %324 = vmatpush.msra.mxu1 %v277_v47  ;;  %v517_v9 = vld [vmem:[#allocation4 + $0x5e8] sm:$0xff]  ;;  %v514_v12 = vld [vmem:[#allocation4 + $0x5d0] sm:$0xff]  ;;  %v463_v14 = vld [vmem:[#allocation4 + $0x438] sm:$0xff] }
  0x2c   : > { %344 = vmatpush.msra.mxu2 %v278_v49  ;;  %364 = vmatpush.msra.mxu3 %v279_v50  ;;  %v413_v10 = vld [vmem:[#allocation4 + $0x2a8] sm:$0xff]  ;;  %v511_v15 = vld [vmem:[#allocation4 + $0x5b8] sm:$0xff]  ;;  %v410_v16 = vld [vmem:[#allocation4 + $0x290] sm:$0xff] }
  0x2d   : > { %257 = vmatpush.msra.mxu0 %v230_v44  ;;  %325 = vmatpush.msra.mxu1 %v274_v51  ;;  %v409_v13 = vld [vmem:[#allocation4 + $0x288] sm:$0xff]  ;;  %v460_v17 = vld [vmem:[#allocation4 + $0x420] sm:$0xff]  ;;  %v406_v18 = vld [vmem:[#allocation4 + $0x270] sm:$0xff] }
  0x2e   : > { %345 = vmatpush.msra.mxu2 %v275_v53  ;;  %365 = vmatpush.msra.mxu3 %v276_v55  ;;  %v508_v19 = vld [vmem:[#allocation4 + $0x5a0] sm:$0xff]  ;;  %v407_v20 = vld [vmem:[#allocation4 + $0x278] sm:$0xff]  ;;  %v457_v21 = vld [vmem:[#allocation4 + $0x408] sm:$0xff] }
  0x2f   : > { %258 = vmatpush.msra.mxu0 %v229_v48  ;;  %326 = vmatpush.msra.mxu1 %v271_v56  ;;  %v403_v22 = vld [vmem:[#allocation4 + $0x258] sm:$0xff]  ;;  %v505_v23 = vld [vmem:[#allocation4 + $0x588] sm:$0xff]  ;;  %v404_v24 = vld [vmem:[#allocation4 + $0x260] sm:$0xff] }
  0x30   : > { %346 = vmatpush.msra.mxu2 %v272_v57  ;;  %366 = vmatpush.msra.mxu3 %v273_v58  ;;  %v454_v25 = vld [vmem:[#allocation4 + $0x3f0] sm:$0xff]  ;;  %v400_v26 = vld [vmem:[#allocation4 + $0x240] sm:$0xff]  ;;  %v401_v28 = vld [vmem:[#allocation4 + $0x248] sm:$0xff] }
  0x31   : > { %259 = vmatpush.msra.mxu0 %v228_v52  ;;  %327 = vmatpush.msra.mxu1 %v268_v59  ;;  %v502_v27 = vld [vmem:[#allocation4 + $0x570] sm:$0xff]  ;;  %v451_v29 = vld [vmem:[#allocation4 + $0x3d8] sm:$0xff]  ;;  %v397_v30 = vld [vmem:[#allocation4 + $0x228] sm:$0xff] }
  0x32   : > { %260 = vmatmul.f32.vlgmr.msra.gmra.mxu0 %v227_v54  ;;  %347 = vmatpush.msra.mxu2 %v269_v60  ;;  %v499_v31 = vld [vmem:[#allocation4 + $0x558] sm:$0xff]  ;;  %v398_v32 = vld [vmem:[#allocation4 + $0x230] sm:$0xff]  ;;  %v448_v33 = vld [vmem:[#allocation4 + $0x3c0] sm:$0xff] }
  0x33   : > { %367 = vmatpush.msra.mxu3 %v270_v61  ;;  %328 = vmatpush.msra.mxu1 %v265_v62  ;;  %v394_v34 = vld [vmem:[#allocation4 + $0x210] sm:$0xff]  ;;  %v496_v35 = vld [vmem:[#allocation4 + $0x540] sm:$0xff]  ;;  %v395_v36 = vld [vmem:[#allocation4 + $0x218] sm:$0xff] }
  0x34   : > { %348 = vmatpush.msra.mxu2 %v266_v63  ;;  %520 = vmatpush.msrb.mxu0 %v421_v1  ;;  %v445_v37 = vld [vmem:[#allocation4 + $0x3a8] sm:$0xff]  ;;  %v391_v38 = vld [vmem:[#allocation4 + $0x1f8] sm:$0xff]  ;;  %v392_v40 = vld [vmem:[#allocation4 + $0x200] sm:$0xff] }
  0x35   : > { %368 = vmatpush.msra.mxu3 %v267_v0  ;;  %540 = vmatpush.msrb.mxu1 %v469_v7  ;;  %v493_v39 = vld [vmem:[#allocation4 + $0x528] sm:$0xff]  ;;  %v442_v41 = vld [vmem:[#allocation4 + $0x390] sm:$0xff]  ;;  %v388_v42 = vld [vmem:[#allocation4 + $0x1e0] sm:$0xff] }
  0x36   : > { %521 = vmatpush.msrb.mxu0 %v418_v2  ;;  %560 = vmatpush.msrb.mxu2 %v517_v9  ;;  %v490_v43 = vld [vmem:[#allocation4 + $0x510] sm:$0xff]  ;;  %v389_v44 = vld [vmem:[#allocation4 + $0x1e8] sm:$0xff]  ;;  %v439_v45 = vld [vmem:[#allocation4 + $0x378] sm:$0xff] }
  0x37   : > { %580 = vmatpush.msrb.mxu3 %v422_v3  ;;  %541 = vmatpush.msrb.mxu1 %v466_v11  ;;  %v385_v46 = vld [vmem:[#allocation4 + $0x1c8] sm:$0xff]  ;;  %v487_v47 = vld [vmem:[#allocation4 + $0x4f8] sm:$0xff]  ;;  %v386_v48 = vld [vmem:[#allocation4 + $0x1d0] sm:$0xff] }
  0x38   : > { %522 = vmatpush.msrb.mxu0 %v415_v4  ;;  %561 = vmatpush.msrb.mxu2 %v514_v12  ;;  %v436_v49 = vld [vmem:[#allocation4 + $0x360] sm:$0xff]  ;;  %v382_v50 = vld [vmem:[#allocation4 + $0x1b0] sm:$0xff]  ;;  %v383_v52 = vld [vmem:[#allocation4 + $0x1b8] sm:$0xff] }
  0x39   : > { %581 = vmatpush.msrb.mxu3 %v419_v5  ;;  %542 = vmatpush.msrb.mxu1 %v463_v14  ;;  %v484_v51 = vld [vmem:[#allocation4 + $0x4e0] sm:$0xff]  ;;  %v433_v53 = vld [vmem:[#allocation4 + $0x348] sm:$0xff]  ;;  %v379_v54 = vld [vmem:[#allocation4 + $0x198] sm:$0xff] }
  0x3a   : > { %523 = vmatpush.msrb.mxu0 %v412_v8  ;;  %562 = vmatpush.msrb.mxu2 %v511_v15  ;;  %v481_v55 = vld [vmem:[#allocation4 + $0x4c8] sm:$0xff]  ;;  %v380_v56 = vld [vmem:[#allocation4 + $0x1a0] sm:$0xff]  ;;  %v430_v57 = vld [vmem:[#allocation4 + $0x330] sm:$0xff] }
  0x3b   : > { %582 = vmatpush.msrb.mxu3 %v416_v6  ;;  %543 = vmatpush.msrb.mxu1 %v460_v17  ;;  %v376_v60 = vld [vmem:[#allocation4 + $0x180] sm:$0xff]  ;;  %v470_v61 = vld [vmem:[#allocation4 + $0x470] sm:$0xff]  ;;  %v377_v62 = vld [vmem:[#allocation4 + $0x188] sm:$0xff] }
  0x3c   : > { %524 = vmatpush.msrb.mxu0 %v409_v13  ;;  %563 = vmatpush.msrb.mxu2 %v508_v19  ;;  %v471_v63 = vld [vmem:[#allocation4 + $0x478] sm:$0xff]  ;;  %v478_v0 = vld [vmem:[#allocation4 + $0x4b0] sm:$0xff]  ;;  %v468_v3 = vld [vmem:[#allocation4 + $0x460] sm:$0xff] }
  0x3d   : > { %583 = vmatpush.msrb.mxu3 %v413_v10  ;;  %544 = vmatpush.msrb.mxu1 %v457_v21  ;;  %v467_v1 = vld [vmem:[#allocation4 + $0x458] sm:$0xff]  ;;  %v464_v5 = vld [vmem:[#allocation4 + $0x440] sm:$0xff]  ;;  %v465_v7 = vld [vmem:[#allocation4 + $0x448] sm:$0xff] }
  0x3e   : > { %525 = vmatpush.msrb.mxu0 %v406_v18  ;;  %564 = vmatpush.msrb.mxu2 %v505_v23  ;;  %v427_v2 = vld [vmem:[#allocation4 + $0x318] sm:$0xff]  ;;  %v424_v6 = vld [vmem:[#allocation4 + $0x300] sm:$0xff]  ;;  %v461_v9 = vld [vmem:[#allocation4 + $0x428] sm:$0xff] }
  0x3f   : > { %584 = vmatpush.msrb.mxu3 %v410_v16  ;;  %545 = vmatpush.msrb.mxu1 %v454_v25  ;;  %v475_v4 = vld [vmem:[#allocation4 + $0x498] sm:$0xff]  ;;  %v472_v8 = vld [vmem:[#allocation4 + $0x480] sm:$0xff]  ;;  %v518_v10 = vld [vmem:[#allocation4 + $0x5f0] sm:$0xff] }
  0x40   : > { %526 = vmatpush.msrb.mxu0 %v403_v22  ;;  %565 = vmatpush.msrb.mxu2 %v502_v27  ;;  %v423_v11 = vld [vmem:[#allocation4 + $0x2f8] sm:$0xff]  ;;  %v462_v12 = vld [vmem:[#allocation4 + $0x430] sm:$0xff]  ;;  %v420_v15 = vld [vmem:[#allocation4 + $0x2e0] sm:$0xff] }
  0x41   : > { %585 = vmatpush.msrb.mxu3 %v407_v20  ;;  %546 = vmatpush.msrb.mxu1 %v451_v29  ;;  %v458_v13 = vld [vmem:[#allocation4 + $0x410] sm:$0xff]  ;;  %v515_v14 = vld [vmem:[#allocation4 + $0x5d8] sm:$0xff]  ;;  %v512_v18 = vld [vmem:[#allocation4 + $0x5c0] sm:$0xff] }
  0x42   : > { %527 = vmatpush.msrb.mxu0 %v400_v26  ;;  %566 = vmatpush.msrb.mxu2 %v499_v31  ;;  %v459_v16 = vld [vmem:[#allocation4 + $0x418] sm:$0xff]  ;;  %v417_v19 = vld [vmem:[#allocation4 + $0x2c8] sm:$0xff]  ;;  %v456_v20 = vld [vmem:[#allocation4 + $0x400] sm:$0xff] }
  0x43   : > { %586 = vmatpush.msrb.mxu3 %v404_v24  ;;  %547 = vmatpush.msrb.mxu1 %v448_v33  ;;  %v455_v17 = vld [vmem:[#allocation4 + $0x3f8] sm:$0xff]  ;;  %v452_v21 = vld [vmem:[#allocation4 + $0x3e0] sm:$0xff]  ;;  %v509_v22 = vld [vmem:[#allocation4 + $0x5a8] sm:$0xff] }
  0x44   : > { %528 = vmatpush.msrb.mxu0 %v397_v30  ;;  %567 = vmatpush.msrb.mxu2 %v496_v35  ;;  %v414_v23 = vld [vmem:[#allocation4 + $0x2b0] sm:$0xff]  ;;  %v453_v24 = vld [vmem:[#allocation4 + $0x3e8] sm:$0xff]  ;;  %v411_v27 = vld [vmem:[#allocation4 + $0x298] sm:$0xff] }
  0x45   : > { %587 = vmatpush.msrb.mxu3 %v401_v28  ;;  %548 = vmatpush.msrb.mxu1 %v445_v37  ;;  %v449_v25 = vld [vmem:[#allocation4 + $0x3c8] sm:$0xff]  ;;  %v506_v26 = vld [vmem:[#allocation4 + $0x590] sm:$0xff]  ;;  %v503_v30 = vld [vmem:[#allocation4 + $0x578] sm:$0xff] }
  0x46   : > { %529 = vmatpush.msrb.mxu0 %v394_v34  ;;  %568 = vmatpush.msrb.mxu2 %v493_v39  ;;  %v450_v28 = vld [vmem:[#allocation4 + $0x3d0] sm:$0xff]  ;;  %v408_v31 = vld [vmem:[#allocation4 + $0x280] sm:$0xff]  ;;  %v443_v33 = vld [vmem:[#allocation4 + $0x398] sm:$0xff] }
  0x47   : > { %588 = vmatpush.msrb.mxu3 %v398_v32  ;;  %549 = vmatpush.msrb.mxu1 %v442_v41  ;;  %v446_v29 = vld [vmem:[#allocation4 + $0x3b0] sm:$0xff]  ;;  %v447_v32 = vld [vmem:[#allocation4 + $0x3b8] sm:$0xff]  ;;  %v500_v34 = vld [vmem:[#allocation4 + $0x560] sm:$0xff] }
  0x48   : > { %530 = vmatpush.msrb.mxu0 %v391_v38  ;;  %569 = vmatpush.msrb.mxu2 %v490_v43  ;;  %v405_v35 = vld [vmem:[#allocation4 + $0x268] sm:$0xff]  ;;  %v440_v37 = vld [vmem:[#allocation4 + $0x380] sm:$0xff]  ;;  %v434_v39 = vld [vmem:[#allocation4 + $0x350] sm:$0xff] }
  0x49   : > { %589 = vmatpush.msrb.mxu3 %v395_v36  ;;  %550 = vmatpush.msrb.mxu1 %v439_v45  ;;  %v444_v36 = vld [vmem:[#allocation4 + $0x3a0] sm:$0xff]  ;;  %v437_v38 = vld [vmem:[#allocation4 + $0x368] sm:$0xff]  ;;  %v402_v43 = vld [vmem:[#allocation4 + $0x250] sm:$0xff] }
  0x4a   : > { %531 = vmatpush.msrb.mxu0 %v388_v42  ;;  %570 = vmatpush.msrb.mxu2 %v487_v47  ;;  %v428_v41 = vld [vmem:[#allocation4 + $0x320] sm:$0xff]  ;;  %v497_v42 = vld [vmem:[#allocation4 + $0x548] sm:$0xff]  ;;  %v399_v47 = vld [vmem:[#allocation4 + $0x238] sm:$0xff] }
  0x4b   : > { %590 = vmatpush.msrb.mxu3 %v392_v40  ;;  %551 = vmatpush.msrb.mxu1 %v436_v49  ;;  %v431_v40 = vld [vmem:[#allocation4 + $0x338] sm:$0xff]  ;;  %v425_v45 = vld [vmem:[#allocation4 + $0x308] sm:$0xff] }
  0x4c   : > { %532 = vmatpush.msrb.mxu0 %v385_v46  ;;  %571 = vmatpush.msrb.mxu2 %v484_v51  ;;  %v494_v46 = vld [vmem:[#allocation4 + $0x530] sm:$0xff]  ;;  %v491_v49 = vld [vmem:[#allocation4 + $0x518] sm:$0xff] }
  0x4d   : > { %591 = vmatpush.msrb.mxu3 %v389_v44  ;;  %552 = vmatpush.msrb.mxu1 %v433_v53  ;;  %v441_v44 = vld [vmem:[#allocation4 + $0x388] sm:$0xff]  ;;  %v435_v51 = vld [vmem:[#allocation4 + $0x358] sm:$0xff] }
  0x4e   : > { %533 = vmatpush.msrb.mxu0 %v382_v50  ;;  %572 = vmatpush.msrb.mxu2 %v481_v55  ;;  %v396_v50 = vld [vmem:[#allocation4 + $0x220] sm:$0xff]  ;;  %v393_v53 = vld [vmem:[#allocation4 + $0x208] sm:$0xff] }
  0x4f   : > { %592 = vmatpush.msrb.mxu3 %v386_v48  ;;  %553 = vmatpush.msrb.mxu1 %v430_v57  ;;  %v438_v48 = vld [vmem:[#allocation4 + $0x370] sm:$0xff]  ;;  %v485_v55 = vld [vmem:[#allocation4 + $0x4e8] sm:$0xff] }
  0x50   : > { %534 = vmatpush.msrb.mxu0 %v379_v54  ;;  %573 = vmatpush.msrb.mxu2 %v478_v0  ;;  %v432_v54 = vld [vmem:[#allocation4 + $0x340] sm:$0xff]  ;;  %v429_v57 = vld [vmem:[#allocation4 + $0x328] sm:$0xff] }
  0x51   : > { %593 = vmatpush.msrb.mxu3 %v383_v52  ;;  %554 = vmatpush.msrb.mxu1 %v427_v2  ;;  %v488_v52 = vld [vmem:[#allocation4 + $0x500] sm:$0xff]  ;;  %v381_v0 = vld [vmem:[#allocation4 + $0x1a8] sm:$0xff]  ;;  %v378_v2 = vld [vmem:[#allocation4 + $0x190] sm:$0xff] }
  0x52   : > { %535 = vmatpush.msrb.mxu0 %v376_v60  ;;  %574 = vmatpush.msrb.mxu2 %v475_v4  ;;  %v426_v60 = vld [vmem:[#allocation4 + $0x310] sm:$0xff] }
  0x53   : > { %594 = vmatpush.msrb.mxu3 %v380_v56  ;;  %555 = vmatpush.msrb.mxu1 %v424_v6  ;;  %v390_v56 = vld [vmem:[#allocation4 + $0x1f0] sm:$0xff]  ;;  %v516_v6 = vld [vmem:[#allocation4 + $0x5e0] sm:$0xff] }
  0x54   : > { %600 = vmatpush.msra.mxu0 %v470_v61  ;;  %575 = vmatpush.msrb.mxu2 %v472_v8  ;;  %v479_v61 = vld [vmem:[#allocation4 + $0x4b8] sm:$0xff] }
  0x55   : > { %595 = vmatpush.msrb.mxu3 %v377_v62  ;;  %v384_v62 = vld [vmem:[#allocation4 + $0x1c0] sm:$0xff] }
  0x56   : > { %601 = vmatpush.msra.mxu0 %v467_v1  ;;  %v473_v1 = vld [vmem:[#allocation4 + $0x488] sm:$0xff] }
  0x58   : > { %602 = vmatpush.msra.mxu0 %v464_v5  ;;  %v519_v5 = vld [vmem:[#allocation4 + $0x5f8] sm:$0xff] }
  0x5a   : > { %603 = vmatpush.msra.mxu0 %v461_v9 }
  0x5c   : > { %604 = vmatpush.msra.mxu0 %v458_v13  ;;  %v507_v13 = vld [vmem:[#allocation4 + $0x598] sm:$0xff] }
  0x5e   : > { %605 = vmatpush.msra.mxu0 %v455_v17  ;;  %v717_v17 = vld [vmem:[#allocation2 + $0xf0] sm:$0xff] }
  0x60   : > { %606 = vmatpush.msra.mxu0 %v452_v21  ;;  %v732_v21 = vld [vmem:[#allocation2 + $0x168] sm:$0xff] }
  0x62   : > { %607 = vmatpush.msra.mxu0 %v449_v25  ;;  %v495_v25 = vld [vmem:[#allocation4 + $0x538] sm:$0xff] }
  0x64   : > { %608 = vmatpush.msra.mxu0 %v446_v29  ;;  %v713_v29 = vld [vmem:[#allocation2 + $0xd0] sm:$0xff] }
  0x66   : > { %609 = vmatpush.msra.mxu0 %v443_v33  ;;  %v486_v33 = vld [vmem:[#allocation4 + $0x4f0] sm:$0xff] }
  0x68   : > { %610 = vmatpush.msra.mxu0 %v440_v37  ;;  %v474_v37 = vld [vmem:[#allocation4 + $0x490] sm:$0xff] }
  0x6a   : > { %611 = vmatpush.msra.mxu0 %v437_v38  ;;  %v711_v38 = vld [vmem:[#allocation2 + $0xc0] sm:$0xff] }
  0x6c   : > { %612 = vmatpush.msra.mxu0 %v434_v39  ;;  %v728_v39 = vld [vmem:[#allocation2 + $0x148] sm:$0xff] }
  0x6e   : > { %613 = vmatpush.msra.mxu0 %v431_v40  ;;  %v710_v40 = vld [vmem:[#allocation2 + $0xb8] sm:$0xff] }
  0x70   : > { %614 = vmatpush.msra.mxu0 %v428_v41  ;;  %v727_v41 = vld [vmem:[#allocation2 + $0x140] sm:$0xff] }
  0x72   : > { %615 = vmatpush.msra.mxu0 %v425_v45  ;;  %v708_v45 = vld [vmem:[#allocation2 + $0xa8] sm:$0xff] }
  0xaf   : > { %v261_v58 = vpop.f32.mrf.mxu0 }
  0xb0   : > { %v264_v59 = vmax.f32 %v261_v58, 0.0  ;;  %v482_v58 = vld [vmem:[#allocation4 + $0x4d0] sm:$0xff] }
  0xb2   : > { %329 = vmatmul.f32.vlgmr.msra.gmra.mxu1 %v264_v59  ;;  %349 = vmatmul.f32.vlgmr.msra.gmra.mxu2 %v264_v59 }
  0xb3   : > { %369 = vmatmul.f32.vlgmr.msra.gmra.mxu3 %v264_v59  ;;  %620 = vmatpush.msra.mxu1 %v518_v10  ;;  %v387_v59 = vld [vmem:[#allocation4 + $0x1d8] sm:$0xff] }
  0xb4   : > { %660 = vmatpush.msra.mxu3 %v471_v63  ;;  %640 = vmatpush.msra.mxu2 %v423_v11  ;;  %v476_v63 = vld [vmem:[#allocation4 + $0x4a0] sm:$0xff]  ;;  %v510_v11 = vld [vmem:[#allocation4 + $0x5b0] sm:$0xff] }
  0xb5   : > { %621 = vmatpush.msra.mxu1 %v515_v14  ;;  %v718_v14 = vld [vmem:[#allocation2 + $0xf8] sm:$0xff] }
  0xb6   : > { %661 = vmatpush.msra.mxu3 %v468_v3  ;;  %641 = vmatpush.msra.mxu2 %v420_v15  ;;  %v734_v15 = vld [vmem:[#allocation2 + $0x178] sm:$0xff] }
  0xb7   : > { %622 = vmatpush.msra.mxu1 %v512_v18  ;;  %v733_v18 = vld [vmem:[#allocation2 + $0x170] sm:$0xff] }
  0xb8   : > { %662 = vmatpush.msra.mxu3 %v465_v7  ;;  %642 = vmatpush.msra.mxu2 %v417_v19  ;;  %v513_v7 = vld [vmem:[#allocation4 + $0x5c8] sm:$0xff] }
  0xb9   : > { %623 = vmatpush.msra.mxu1 %v509_v22  ;;  %v501_v19 = vld [vmem:[#allocation4 + $0x568] sm:$0xff]  ;;  %v498_v22 = vld [vmem:[#allocation4 + $0x550] sm:$0xff] }
  0xba   : > { %663 = vmatpush.msra.mxu3 %v462_v12  ;;  %643 = vmatpush.msra.mxu2 %v414_v23  ;;  %v715_v23 = vld [vmem:[#allocation2 + $0xe0] sm:$0xff] }
  0xbb   : > { %624 = vmatpush.msra.mxu1 %v506_v26  ;;  %v714_v26 = vld [vmem:[#allocation2 + $0xd8] sm:$0xff] }
  0xbc   : > { %664 = vmatpush.msra.mxu3 %v459_v16  ;;  %644 = vmatpush.msra.mxu2 %v411_v27  ;;  %v504_v16 = vld [vmem:[#allocation4 + $0x580] sm:$0xff]  ;;  %v730_v27 = vld [vmem:[#allocation2 + $0x158] sm:$0xff] }
  0xbd   : > { %625 = vmatpush.msra.mxu1 %v503_v30  ;;  %v729_v30 = vld [vmem:[#allocation2 + $0x150] sm:$0xff] }
  0xbe   : > { %665 = vmatpush.msra.mxu3 %v456_v20  ;;  %645 = vmatpush.msra.mxu2 %v408_v31  ;;  %v716_v20 = vld [vmem:[#allocation2 + $0xe8] sm:$0xff] }
  0xbf   : > { %626 = vmatpush.msra.mxu1 %v500_v34  ;;  %v489_v31 = vld [vmem:[#allocation4 + $0x508] sm:$0xff]  ;;  %v483_v34 = vld [vmem:[#allocation4 + $0x4d8] sm:$0xff] }
  0xc0   : > { %666 = vmatpush.msra.mxu3 %v453_v24  ;;  %646 = vmatpush.msra.mxu2 %v405_v35  ;;  %v731_v24 = vld [vmem:[#allocation2 + $0x160] sm:$0xff] }
  0xc1   : > { %627 = vmatpush.msra.mxu1 %v497_v42  ;;  %v480_v35 = vld [vmem:[#allocation4 + $0x4c0] sm:$0xff]  ;;  %v709_v42 = vld [vmem:[#allocation2 + $0xb0] sm:$0xff] }
  0xc2   : > { %667 = vmatpush.msra.mxu3 %v450_v28  ;;  %647 = vmatpush.msra.mxu2 %v402_v43  ;;  %v492_v28 = vld [vmem:[#allocation4 + $0x520] sm:$0xff]  ;;  %v726_v43 = vld [vmem:[#allocation2 + $0x138] sm:$0xff] }
  0xc3   : > { %628 = vmatpush.msra.mxu1 %v494_v46  ;;  %v725_v46 = vld [vmem:[#allocation2 + $0x130] sm:$0xff] }
  0xc4   : > { %668 = vmatpush.msra.mxu3 %v447_v32  ;;  %648 = vmatpush.msra.mxu2 %v399_v47  ;;  %v712_v32 = vld [vmem:[#allocation2 + $0xc8] sm:$0xff]  ;;  %v749_v47 = vld [vmem:[#allocation2 + $0x1f0] sm:$0xff] }
  0xc5   : > { %629 = vmatpush.msra.mxu1 %v491_v49  ;;  %v724_v49 = vld [vmem:[#allocation2 + $0x128] sm:$0xff] }
  0xc6   : > { %669 = vmatpush.msra.mxu3 %v444_v36  ;;  %649 = vmatpush.msra.mxu2 %v396_v50  ;;  %v477_v36 = vld [vmem:[#allocation4 + $0x4a8] sm:$0xff] }
  0xc7   : > { %630 = vmatpush.msra.mxu1 %v488_v52  ;;  %v748_v50 = vld [vmem:[#allocation2 + $0x1e8] sm:$0xff]  ;;  %v723_v52 = vld [vmem:[#allocation2 + $0x120] sm:$0xff] }
  0xc8   : > { %670 = vmatpush.msra.mxu3 %v441_v44  ;;  %650 = vmatpush.msra.mxu2 %v393_v53  ;;  %v750_v44 = vld [vmem:[#allocation2 + $0x1f8] sm:$0xff]  ;;  %v747_v53 = vld [vmem:[#allocation2 + $0x1e0] sm:$0xff] }
  0xc9   : > { %631 = vmatpush.msra.mxu1 %v485_v55  ;;  %v722_v55 = vld [vmem:[#allocation2 + $0x118] sm:$0xff] }
  0xca   : > { %671 = vmatpush.msra.mxu3 %v438_v48  ;;  %651 = vmatpush.msra.mxu2 %v390_v56  ;;  %v707_v48 = vld [vmem:[#allocation2 + $0xa0] sm:$0xff]  ;;  %v746_v56 = vld [vmem:[#allocation2 + $0x1d8] sm:$0xff] }
  0xcb   : > { %632 = vmatpush.msra.mxu1 %v482_v58  ;;  %v721_v58 = vld [vmem:[#allocation2 + $0x110] sm:$0xff] }
  0xcc   : > { %672 = vmatpush.msra.mxu3 %v435_v51  ;;  %652 = vmatpush.msra.mxu2 %v387_v59  ;;  %v706_v51 = vld [vmem:[#allocation2 + $0x98] sm:$0xff]  ;;  %v745_v59 = vld [vmem:[#allocation2 + $0x1d0] sm:$0xff] }
  0xcd   : > { %633 = vmatpush.msra.mxu1 %v479_v61  ;;  %v720_v61 = vld [vmem:[#allocation2 + $0x108] sm:$0xff] }
  0xce   : > { %673 = vmatpush.msra.mxu3 %v432_v54  ;;  %653 = vmatpush.msra.mxu2 %v384_v62  ;;  %v705_v54 = vld [vmem:[#allocation2 + $0x90] sm:$0xff]  ;;  %v744_v62 = vld [vmem:[#allocation2 + $0x1c8] sm:$0xff] }
  0xcf   : > { %634 = vmatpush.msra.mxu1 %v476_v63  ;;  %v719_v63 = vld [vmem:[#allocation2 + $0x100] sm:$0xff] }
  0xd0   : > { %674 = vmatpush.msra.mxu3 %v429_v57  ;;  %654 = vmatpush.msra.mxu2 %v381_v0  ;;  %v704_v57 = vld [vmem:[#allocation2 + $0x88] sm:$0xff]  ;;  %v743_v0 = vld [vmem:[#allocation2 + $0x1c0] sm:$0xff] }
  0xd1   : > { %635 = vmatpush.msra.mxu1 %v473_v1  ;;  %v742_v1 = vld [vmem:[#allocation2 + $0x1b8] sm:$0xff] }
  0xd2   : > { %675 = vmatpush.msra.mxu3 %v426_v60  ;;  %655 = vmatpush.msra.mxu2 %v378_v2  ;;  %v703_v60 = vld [vmem:[#allocation2 + $0x80] sm:$0xff]  ;;  %v741_v2 = vld [vmem:[#allocation2 + $0x1b0] sm:$0xff] }
 0x12f   : > { %v330_v3 = vpop.f32.mrf.mxu1 }
 0x130   : > { %v373_v4 = vmax.f32 %v330_v3, 0.0  ;;  %v740_v3 = vld [vmem:[#allocation2 + $0x1a8] sm:$0xff] }
 0x132   : > { %536 = vmatmul.f32.vlgmr.msrb.gmra.mxu0 %v373_v4  ;;  %596 = vmatmul.f32.vlgmr.msrb.gmra.mxu3 %v373_v4 }
 0x133   : > { %680 = vmatpush.msrb.mxu0 %v519_v5  ;;  %791 = vmatpush.msrb.mxu3 %v750_v44  ;;  %v738_v5 = vld [vmem:[#allocation2 + $0x198] sm:$0xff]  ;;  %v863_v44 = vld [vmem:[#allocation2 + $0x2f0] sm:$0xff] }
 0x135   : > { %681 = vmatpush.msrb.mxu0 %v516_v6  ;;  %v350_v8 = vpop.f32.mrf.mxu2  ;;  %792 = vmatpush.msrb.mxu3 %v749_v47  ;;  %v737_v6 = vld [vmem:[#allocation2 + $0x190] sm:$0xff]  ;;  %v860_v47 = vld [vmem:[#allocation2 + $0x2d8] sm:$0xff] }
 0x136   : > { %v374_v9 = vmax.f32 %v350_v8, 0.0  ;;  %v370_v10 = vpop.f32.mrf.mxu3  ;;  %v736_v8 = vld [vmem:[#allocation2 + $0x188] sm:$0xff] }
 0x137   : > { %v375_v12 = vmax.f32 %v370_v10, 0.0  ;;  %682 = vmatpush.msrb.mxu0 %v513_v7  ;;  %793 = vmatpush.msrb.mxu3 %v748_v50  ;;  %v827_v10 = vld [vmem:[#allocation2 + $0x278] sm:$0xff]  ;;  %v857_v50 = vld [vmem:[#allocation2 + $0x2c0] sm:$0xff] }
 0x138   : > { %556 = vmatmul.f32.vlgmr.msrb.gmra.mxu1 %v374_v9 }
 0x139   : > { %576 = vmatmul.f32.vlgmr.msrb.gmra.mxu2 %v375_v12  ;;  %683 = vmatpush.msrb.mxu0 %v510_v11 }
 0x13a   : > { %616 = vmatmul.f32.vlgmr.msra.gmra.mxu0 %v374_v9  ;;  %676 = vmatmul.f32.vlgmr.msra.gmra.mxu3 %v374_v9  ;;  %v735_v9 = vld [vmem:[#allocation2 + $0x180] sm:$0xff] }
 0x13b   : > { %684 = vmatpush.msrb.mxu0 %v507_v13  ;;  %751 = vmatpush.msrb.mxu1 %v718_v14 }
 0x13c   : > { %771 = vmatpush.msrb.mxu2 %v734_v15  ;;  %794 = vmatpush.msrb.mxu3 %v747_v53  ;;  %v854_v53 = vld [vmem:[#allocation2 + $0x2a8] sm:$0xff] }
 0x13d   : > { %685 = vmatpush.msrb.mxu0 %v504_v16  ;;  %752 = vmatpush.msrb.mxu1 %v717_v17 }
 0x13e   : > { %772 = vmatpush.msrb.mxu2 %v733_v18  ;;  %795 = vmatpush.msrb.mxu3 %v746_v56 }
 0x13f   : > { %686 = vmatpush.msrb.mxu0 %v501_v19  ;;  %753 = vmatpush.msrb.mxu1 %v716_v20 }
 0x140   : > { %636 = vmatmul.f32.vlgmr.msra.gmra.mxu1 %v375_v12  ;;  %773 = vmatpush.msrb.mxu2 %v732_v21 }
 0x141   : > { %656 = vmatmul.f32.vlgmr.msra.gmra.mxu2 %v373_v4  ;;  %687 = vmatpush.msrb.mxu0 %v498_v22  ;;  %v739_v4 = vld [vmem:[#allocation2 + $0x1a0] sm:$0xff] }
 0x142   : > { %754 = vmatpush.msrb.mxu1 %v715_v23  ;;  %774 = vmatpush.msrb.mxu2 %v731_v24 }
 0x143   : > { %688 = vmatpush.msrb.mxu0 %v495_v25  ;;  %796 = vmatpush.msrb.mxu3 %v745_v59 }
 0x144   : > { %755 = vmatpush.msrb.mxu1 %v714_v26  ;;  %775 = vmatpush.msrb.mxu2 %v730_v27 }
 0x145   : > { %689 = vmatpush.msrb.mxu0 %v492_v28  ;;  %797 = vmatpush.msrb.mxu3 %v744_v62  ;;  %v826_v28 = vld [vmem:[#allocation2 + $0x270] sm:$0xff] }
 0x146   : > { %756 = vmatpush.msrb.mxu1 %v713_v29  ;;  %776 = vmatpush.msrb.mxu2 %v729_v30  ;;  %v825_v29 = vld [vmem:[#allocation2 + $0x268] sm:$0xff]  ;;  %v824_v30 = vld [vmem:[#allocation2 + $0x260] sm:$0xff] }
 0x147   : > { %690 = vmatpush.msrb.mxu0 %v489_v31  ;;  %798 = vmatpush.msrb.mxu3 %v743_v0  ;;  %v823_v31 = vld [vmem:[#allocation2 + $0x258] sm:$0xff]  ;;  %v849_v0 = vld [vmem:[#allocation2 + $0x280] sm:$0xff] }
 0x148   : > { %757 = vmatpush.msrb.mxu1 %v712_v32  ;;  %777 = vmatpush.msrb.mxu2 %v728_v39  ;;  %v822_v32 = vld [vmem:[#allocation2 + $0x250] sm:$0xff]  ;;  %v815_v39 = vld [vmem:[#allocation2 + $0x218] sm:$0xff] }
 0x149   : > { %691 = vmatpush.msrb.mxu0 %v486_v33  ;;  %799 = vmatpush.msrb.mxu3 %v742_v1  ;;  %v821_v33 = vld [vmem:[#allocation2 + $0x248] sm:$0xff] }
 0x14a   : > { %758 = vmatpush.msrb.mxu1 %v711_v38  ;;  %778 = vmatpush.msrb.mxu2 %v727_v41  ;;  %v816_v38 = vld [vmem:[#allocation2 + $0x220] sm:$0xff]  ;;  %v813_v41 = vld [vmem:[#allocation2 + $0x208] sm:$0xff] }
 0x14b   : > { %692 = vmatpush.msrb.mxu0 %v483_v34  ;;  %800 = vmatpush.msrb.mxu3 %v741_v2  ;;  %v820_v34 = vld [vmem:[#allocation2 + $0x240] sm:$0xff] }
 0x14c   : > { %759 = vmatpush.msrb.mxu1 %v710_v40  ;;  %779 = vmatpush.msrb.mxu2 %v726_v43  ;;  %v814_v40 = vld [vmem:[#allocation2 + $0x210] sm:$0xff]  ;;  %v864_v43 = vld [vmem:[#allocation2 + $0x2f8] sm:$0xff] }
 0x14d   : > { %693 = vmatpush.msrb.mxu0 %v480_v35  ;;  %801 = vmatpush.msrb.mxu3 %v740_v3  ;;  %v819_v35 = vld [vmem:[#allocation2 + $0x238] sm:$0xff]  ;;  %v1395_v3 = vld [vmem:[%s1453_s3] sm:$0x1] }
 0x14e   : > { %760 = vmatpush.msrb.mxu1 %v709_v42  ;;  %780 = vmatpush.msrb.mxu2 %v725_v46  ;;  %v812_v42 = vld [vmem:[#allocation2 + $0x200] sm:$0xff] }
 0x14f   : > { %694 = vmatpush.msrb.mxu0 %v477_v36  ;;  %802 = vmatpush.msrb.mxu3 %v739_v4  ;;  %v818_v36 = vld [vmem:[#allocation2 + $0x230] sm:$0xff]  ;;  %v861_v46 = vld [vmem:[#allocation2 + $0x2e0] sm:$0xff]  ;;  %v886_v4 = vmul.f32 1.442695, %v1395_v3 }
 0x150   : > { %761 = vmatpush.msrb.mxu1 %v708_v45  ;;  %781 = vmatpush.msrb.mxu2 %v724_v49  ;;  %v862_v45 = vld [vmem:[#allocation2 + $0x2e8] sm:$0xff] }
 0x151   : > { %695 = vmatpush.msrb.mxu0 %v474_v37  ;;  %803 = vmatpush.msrb.mxu3 %v738_v5  ;;  %v817_v37 = vld [vmem:[#allocation2 + $0x228] sm:$0xff]  ;;  %1214 = vpow2.f32 %v886_v4 }
 0x152   : > { %696 = vmatmul.f32.vlgmr.msrb.gmra.mxu0 %v375_v12  ;;  %762 = vmatpush.msrb.mxu1 %v707_v48  ;;  %v859_v48 = vld [vmem:[#allocation2 + $0x2d0] sm:$0xff]  ;;  %v858_v49 = vld [vmem:[#allocation2 + $0x2c8] sm:$0xff] }
 0x153   : > { %782 = vmatpush.msrb.mxu2 %v723_v52  ;;  %804 = vmatpush.msrb.mxu3 %v737_v6  ;;  %v855_v52 = vld [vmem:[#allocation2 + $0x2b0] sm:$0xff] }
 0x154   : > { %763 = vmatpush.msrb.mxu1 %v706_v51  ;;  %828 = vmatpush.msra.mxu0 %v827_v10  ;;  %v856_v51 = vld [vmem:[#allocation2 + $0x2b8] sm:$0xff] }
 0x155   : > { %783 = vmatpush.msrb.mxu2 %v722_v55  ;;  %805 = vmatpush.msrb.mxu3 %v736_v8  ;;  %v852_v55 = vld [vmem:[#allocation2 + $0x298] sm:$0xff] }
 0x156   : > { %764 = vmatpush.msrb.mxu1 %v705_v54  ;;  %829 = vmatpush.msra.mxu0 %v826_v28  ;;  %v853_v54 = vld [vmem:[#allocation2 + $0x2a0] sm:$0xff] }
 0x157   : > { %784 = vmatpush.msrb.mxu2 %v721_v58  ;;  %806 = vmatpush.msrb.mxu3 %v735_v9  ;;  %v1215_v5 = vpop.eup %1214  ;;  %v1213_v9 = vld [vmem:[%s1453_s3] ss:$0 sm:$0xff] }
 0x158   : > { %765 = vmatpush.msrb.mxu1 %v704_v57  ;;  %830 = vmatpush.msra.mxu0 %v825_v29  ;;  %v851_v57 = vld [vmem:[#allocation2 + $0x290] sm:$0xff]  ;;  %v913_v6 = vperm.slane %v1215_v5, 0 }
 0x159   : > { %785 = vmatpush.msrb.mxu2 %v720_v61 }
 0x15a   : > { %766 = vmatpush.msrb.mxu1 %v703_v60  ;;  %831 = vmatpush.msra.mxu0 %v824_v30 }
 0x15b   : > { %786 = vmatpush.msrb.mxu2 %v719_v63  ;;  %v850_v63 = vld [vmem:[#allocation2 + $0x288] sm:$0xff] }
 0x15c   : > { %832 = vmatpush.msra.mxu0 %v823_v31  ;;  %865 = vmatpush.msra.mxu1 %v864_v43 }
 0x15e   : > { %833 = vmatpush.msra.mxu0 %v822_v32  ;;  %866 = vmatpush.msra.mxu1 %v863_v44 }
 0x160   : > { %834 = vmatpush.msra.mxu0 %v821_v33  ;;  %867 = vmatpush.msra.mxu1 %v862_v45 }
 0x162   : > { %835 = vmatpush.msra.mxu0 %v820_v34  ;;  %868 = vmatpush.msra.mxu1 %v861_v46 }
 0x164   : > { %836 = vmatpush.msra.mxu0 %v819_v35  ;;  %869 = vmatpush.msra.mxu1 %v860_v47 }
 0x166   : > { %837 = vmatpush.msra.mxu0 %v818_v36  ;;  %870 = vmatpush.msra.mxu1 %v859_v48 }
 0x168   : > { %838 = vmatpush.msra.mxu0 %v817_v37  ;;  %871 = vmatpush.msra.mxu1 %v858_v49 }
 0x16a   : > { %839 = vmatpush.msra.mxu0 %v816_v38  ;;  %872 = vmatpush.msra.mxu1 %v857_v50  ;;  %v1312_v38 = vmov 0.0  }
 0x16c   : > { %840 = vmatpush.msra.mxu0 %v815_v39  ;;  %873 = vmatpush.msra.mxu1 %v856_v51 }
 0x16e   : > { %841 = vmatpush.msra.mxu0 %v814_v40  ;;  %874 = vmatpush.msra.mxu1 %v855_v52 }
 0x170   : > { %842 = vmatpush.msra.mxu0 %v813_v41  ;;  %875 = vmatpush.msra.mxu1 %v854_v53 }
 0x172   : > { %843 = vmatpush.msra.mxu0 %v812_v42  ;;  %876 = vmatpush.msra.mxu1 %v853_v54 }
 0x174   : > { %877 = vmatpush.msra.mxu1 %v852_v55 }
 0x176   : > { %878 = vmatpush.msra.mxu1 %v851_v57 }
 0x178   : > { %879 = vmatpush.msra.mxu1 %v850_v63 }
 0x17a   : > { %880 = vmatpush.msra.mxu1 %v849_v0 }
 0x1af   : > { %v537_v7 = vpop.f32.mrf.mxu0 }
 0x1b5   : > { %v557_v11 = vpop.f32.mrf.mxu1  ;;  %v597_v14 = vpop.f32.mrf.mxu3 }
 0x1b6   : > { %v558_v13 = vadd.f32 %v557_v11, %v537_v7 }
 0x1b7   : > { %v617_v12 = vpop.f32.mrf.mxu0 }
 0x1b8   : > { %v618_v15 = vadd.f32 %v617_v12, %v597_v14 }
 0x1bc   : > { %v577_v16 = vpop.f32.mrf.mxu2 }
 0x1bd   : > { %v578_v17 = vadd.f32 %v577_v16, %v558_v13  ;;  %v637_v18 = vpop.f32.mrf.mxu1  ;;  %v677_v23 = vpop.f32.mrf.mxu3 }
 0x1be   : > { %v638_v19 = vadd.f32 %v637_v18, %v618_v15 }
 0x1bf   : > { %v700_v20 = vmax.f32 %v578_v17, 0.0 }
 0x1c0   : > { %v701_v21 = vmax.f32 %v638_v19, 0.0 }
 0x1c1   : > { %767 = vmatmul.f32.vlgmr.msrb.gmra.mxu1 %v700_v20  ;;  %v946_v20 = vlaneseq }
 0x1c2   : > { %787 = vmatmul.f32.vlgmr.msrb.gmra.mxu2 %v701_v21 }
 0x1c3   : > { %v1412_v31 = vand.u32 127, %v946_v20 }
 0x1c4   : > { %v657_v22 = vpop.f32.mrf.mxu2 }
 0x1c5   : > { %v678_v24 = vadd.f32 %v677_v23, %v657_v22 }
 0x1cf   : > { %v697_v25 = vpop.f32.mrf.mxu0 }
 0x1d0   : > { %v698_v26 = vadd.f32 %v697_v25, %v678_v24  ;;  %v947_v24 = vshrl.u32 %v946_v20, 7 }
 0x1d2   : > { %v702_v27 = vmax.f32 %v698_v26, 0.0 }
 0x1d4   : > { %807 = vmatmul.f32.vlgmr.msrb.gmra.mxu3 %v702_v27  ;;  %v948_v27 = vstv %s1164_s20 }
 0x1d5   : > { %v1410_v30 = vadd.s32 %v948_v27, %v947_v24 }
 0x1d7   : > { %v952_v35 = vadd.s32 %v1412_v31, %v1410_v30  ;;  %vm1031_vm12 = vcmp.ge.s32.totalorder %v1410_v30, 3  ;;  %vm1032_vm13 = vcmp.lt.s32.totalorder %v1410_v30, 6 }
 0x1d8   : > { %vm1033_vm14 = vmand %vm1031_vm12, %vm1032_vm13 }
 0x1d9   : > { %vm953_vm6 = vcmp.ge.s32.totalorder %v952_v35, 3 }
 0x1da   : > { %v1165_v39 = vsel %vm953_vm6, 1.0, %v1312_v38  ;;  %vm1061_vm6 = vcmp.eq.s32.totalorder %v1412_v31, 11 }
 0x23e   : > { %v768_v58 = vpop.f32.mrf.mxu1 }
 0x245   : > { %v788_v56 = vpop.f32.mrf.mxu2 }
 0x246   : > { %v789_v59 = vadd.f32 %v788_v56, %v768_v58 }
 0x257   : > { %v808_v60 = vpop.f32.mrf.mxu3 }
 0x258   : > { %v809_v61 = vadd.f32 %v808_v60, %v789_v59 }
 0x25a   : > { %v811_v62 = vmax.f32 %v809_v61, 0.0 }
 0x25c   : > { %844 = vmatmul.f32.vlgmr.msra.gmra.mxu0 %v811_v62 }
 0x2d9   : > { %v845_v1 = vpop.f32.mrf.mxu0 }
 0x2da   : > { %v848_v2 = vmax.f32 %v845_v1, 0.0 }
 0x2dc   : > { %881 = vmatmul.f32.vlgmr.msra.gmra.mxu1 %v848_v2 }
 0x359   : > { %v1398_v7 = vpop.f32.mrf.mxu1 }
 0x35a   : > { %v915_v8 = vmul.f32 %v913_v6, %v1398_v7 }
 0x35c   : > { %917 = vrot.lane.b32.xlu0 %v915_v8, %s1309_s13 }
 0x364   : > { %890 = vrot.lane.b32.xlu0 %v1213_v9, %s1310_s17 }
 0x36c   : > { %991 = vrot.lane.b32.xlu0 %v1213_v9, %s1311_s18 }
 0x3ce   : > { %v918_v10 = vpop.permute.xlu0 %917 }
 0x3cf   : > { %v920_v11 = vsub.f32 %v915_v8, %v918_v10  ;;  %v1226_v10 = vld [vmem:[%s1389_s10] sm:$0xff] }
 0x3d0   : > { %vm1034_vm15 = vcmp.ge.f32.partialorder %v1226_v10, 0.0 }
 0x3d1   : > { %v921_v12 = vand.u32 2147483647, %v920_v11  ;;  %vm941_vm5 = vcmp.ge.f32.partialorder %v920_v11, 0.0 }
 0x3d3   : > { %v922_v13 = vsub.f32 0.0, %v921_v12  ;;  %v1314_v12 = vmov 10  }
 0x3d4   : > { %1212 = vset.pattern.permute.xlu0 %v1314_v12 }
 0x3d5   : > { %v923_v14 = vmul.f32 1.442695, %v922_v13 }
 0x3d6   : > { %v1406_v15 = vpop.permute.xlu0 %890 }
 0x3d7   : > { %1216 = vpow2.f32 %v923_v14  ;;  %v894_v16 = vsel %vm893_vm0, %v1406_v15, 0.0  ;;  %vm1047_vm0 = vcmask 89168  }
 0x3d8   : > { %895 = vadd.xlane.f32.xlu1 %v894_v16 }
 0x3dd   : > { %v1217_v17 = vpop.eup %1216 }
 0x3de   : > { %v925_v18 = vadd.f32 1.0, %v1217_v17  ;;  %v992_v62 = vpop.permute.xlu0 %991 }
 0x3e0   : > { %1218 = vrcp.f32 %v925_v18  ;;  %v937_v23 = vand.u32 2147483648, %v925_v18  ;;  %v935_v26 = vand.u32 2147483647, %v925_v18  ;;  %vm931_vm2 = vweird.f32 %v925_v18 }
 0x3e2   : > { %v938_v29 = vor.u32 1.1754944e-38, %v937_v23  ;;  %vm936_vm4 = vcmp.eq.f32.partialorder %v935_v26, 8.507059e+37 }
 0x3e6   : > { %v1219_v19 = vpop.eup %1218 }
 0x3e7   : > { %v927_v21 = vmul.f32 %v1219_v19, %v925_v18  ;;  %vm932_vm1 = vweird.f32 %v1219_v19 }
 0x3e8   : > { %vm933_vm3 = vmor %vm931_vm2, %vm932_vm1  ;;  %vm1010_vm1 = vcmp.lt.s32.totalorder %v1410_v30, 16  ;;  %vm1023_vm2 = vcmask 72768  }
 0x3e9   : > { %v928_v22 = vsub.f32 1.0, %v927_v21 }
 0x3eb   : > { %v929_v25 = vmul.f32 %v1219_v19, %v928_v22 }
 0x3ed   : > { %v930_v28 = vadd.f32 %v1219_v19, %v929_v25 }
 0x3ef   : > { %v934_v32 = vsel %vm933_vm3, %v1219_v19, %v930_v28  ;;  %v1167_v19 = vsel %vm1034_vm15, 1.0, %v1312_v38  ;;  %vm1055_vm3 = vcmp.eq.s32.totalorder %v1412_v31, 8 }
 0x3f0   : > { %v939_v33 = vsel %vm936_vm4, %v938_v29, %v934_v32  ;;  %v1042_v20 = vsub.f32 1.0, %v1167_v19  ;;  %vm1057_vm4 = vcmp.eq.s32.totalorder %v1412_v31, 9 }
 0x3f1   : > { %v942_v34 = vsub.f32 1.0, %v939_v33 }
 0x3f3   : > { %v943_v36 = vsel %vm941_vm5, %v939_v33, %v942_v34  ;;  %vm1059_vm5 = vcmp.eq.s32.totalorder %v1412_v31, 10 }
 0x3f4   : > { %970 = vrot.lane.b32.xlu2 %v943_v36, %s1309_s13  ;;  %v944_v37 = vsub.f32 1.0, %v943_v36  ;;  %v1316_v36 = vmov 8  }
 0x3f5   : > { %1211 = vset.pattern.permute.xlu2 %v1316_v36 }
 0x3f6   : > { %960 = vrot.lane.b32.xlu1 %v944_v37, %s1309_s13 }
 0x3fc   : > { %965 = vrot.lane.b32.xlu2 %v1165_v39, %s1313_s19 }
 0x44b   : > { %v896_v40 = vpop.xlane.xlu1 %895 }
 0x44c   : > { %1220 = vrcp.f32 %v896_v40  ;;  %v908_v44 = vand.u32 2147483648, %v896_v40  ;;  %v906_v46 = vand.u32 2147483647, %v896_v40  ;;  %vm902_vm8 = vweird.f32 %v896_v40 }
 0x44e   : > { %v909_v48 = vor.u32 1.1754944e-38, %v908_v44  ;;  %vm907_vm10 = vcmp.eq.f32.partialorder %v906_v46, 8.507059e+37  ;;  %v971_v52 = vpop.permute.xlu2 %970 }
 0x452   : > { %v1221_v41 = vpop.eup %1220 }
 0x453   : > { %v898_v42 = vmul.f32 %v1221_v41, %v896_v40  ;;  %vm903_vm7 = vweird.f32 %v1221_v41 }
 0x454   : > { %vm904_vm9 = vmor %vm902_vm8, %vm903_vm7  ;;  %vm1063_vm7 = vcmp.eq.s32.totalorder %v1412_v31, 12  ;;  %vm1070_vm8 = vcmp.eq.s32.totalorder %v1412_v31, 13 }
 0x455   : > { %v899_v43 = vsub.f32 1.0, %v898_v42 }
 0x456   : > { %v966_v55 = vpop.permute.xlu2 %965 }
 0x457   : > { %v900_v45 = vmul.f32 %v1221_v41, %v899_v43 }
 0x459   : > { %v901_v47 = vadd.f32 %v1221_v41, %v900_v45 }
 0x45b   : > { %v905_v49 = vsel %vm904_vm9, %v1221_v41, %v901_v47  ;;  %v1166_v41 = vsel %vm1010_vm1, 1.0, %v1312_v38 }
 0x45c   : > { %v910_v50 = vsel %vm907_vm10, %v909_v48, %v905_v49 }
 0x45d   : > { %v911_v51 = vmul.f32 %v910_v50, %v1395_v3 }
 0x45f   : > { %v957_v53 = vperm.slane %v911_v51, 0 }
 0x461   : > { %v973_v54 = vmul.f32 %v971_v52, %v957_v53 }
 0x463   : > { %v974_v58 = vmul.f32 %v973_v54, %v966_v55 }
 0x468   : > { %v961_v56 = vpop.permute.xlu1 %960 }
 0x469   : > { %v963_v57 = vmul.f32 %v961_v56, %v957_v53 }
 0x46b   : > { %v968_v59 = vmul.f32 %v966_v55, %v963_v57 }
 0x46d   : > { %976 = vrot.lane.b32.xlu0 %v968_v59, %s1310_s17  ;;  %v990_v60 = vsub.f32 %v974_v58, %v968_v59 }
 0x46f   : > { %v1002_v61 = vmul.f32 %v990_v60, %v1406_v15  ;;  %v994_v63 = vmul.f32 %v992_v62, %v990_v60 }
 0x471   : > { %1004 = vrot.lane.b32.xlu2 %v1002_v61, %s1310_s17 }
 0x475   : > { %996 = vrot.lane.b32.xlu0 %v994_v63, %s1310_s17 }
 0x479   : > { %984 = vrot.lane.b32.xlu2 %v974_v58, %s1310_s17 }
 0x4cb   : > { %v1005_v0 = vpop.permute.xlu2 %1004 }
 0x4cc   : > { %v1007_v1 = vsel %vm979_vm11, %v1005_v0, 0.0 }
 0x4cd   : > { %1008 = vadd.xlane.f32.xlu2 %v1007_v1 }
 0x4d3   : > { %v985_v2 = vpop.permute.xlu2 %984 }
 0x4d4   : > { %v987_v3 = vsel %vm979_vm11, %v985_v2, 0.0 }
 0x4d5   : > { %988 = vadd.xlane.f32.xlu0 %v987_v3 }
 0x4df   : > { %v977_v4 = vpop.permute.xlu0 %976 }
 0x4e0   : > { %v980_v5 = vsel %vm979_vm11, %v977_v4, 0.0 }
 0x4e1   : > { %981 = vadd.xlane.f32.xlu1 %v980_v5 }
 0x4e7   : > { %v997_v6 = vpop.permute.xlu0 %996 }
 0x4e8   : > { %v999_v8 = vsel %vm979_vm11, %v997_v6, 0.0 }
 0x4e9   : > { %1000 = vadd.xlane.f32.xlu2 %v999_v8 }
 0x540   : > { %v1425_v9 = vpop.xlane.xlu2 %1008 }
 0x541   : > { %v1014_v11 = vsub.f32 %v1425_v9, %v1226_v10 }
 0x543   : > { %v1016_v13 = vmul.f32 %v1014_v11, %v1014_v11 }
 0x545   : > { %1018 = vrot.lane.b32.xlu1 %v1016_v13, %s1315_s21 }
 0x548   : > { %v989_v14 = vpop.xlane.xlu0 %988 }
 0x549   : > { %v1038_v15 = vsel %vm1033_vm14, %v989_v14, 1.0 }
 0x54a   : > { %1222 = vlog2.f32 %v1038_v15 }
 0x550   : > { %v1223_v18 = vpop.eup %1222 }
 0x551   : > { %v1040_v21 = vmul.f32 0.6931472, %v1223_v18 }
 0x553   : > { %v1041_v24 = vmul.f32 %v1167_v19, %v1040_v21 }
 0x554   : > { %v982_v16 = vpop.xlane.xlu1 %981 }
 0x555   : > { %v1037_v17 = vsel %vm1033_vm14, %v982_v16, 1.0  ;;  %v1056_v30 = vsel %vm1055_vm3, %v982_v16, %v1398_v7 }
 0x556   : > { %1224 = vlog2.f32 %v1037_v17  ;;  %v1058_v38 = vsel %vm1057_vm4, %v989_v14, %v1056_v30 }
 0x55c   : > { %v1225_v22 = vpop.eup %1224  ;;  %v1001_v37 = vpop.xlane.xlu2 %1000 }
 0x55d   : > { %v1044_v23 = vmul.f32 0.6931472, %v1225_v22  ;;  %v1013_v39 = vsub.f32 %v1001_v37, %v1226_v10  ;;  %v1060_v52 = vsel %vm1059_vm5, %v1001_v37, %v1058_v38 }
 0x55e   : > { %v1062_v7 = vsel %vm1061_vm6, %v1425_v9, %v1060_v52 }
 0x55f   : > { %v1045_v25 = vmul.f32 %v1044_v23, %v1042_v20  ;;  %v1015_v40 = vmul.f32 %v1013_v39, %v1013_v39 }
 0x561   : > { %v1046_v26 = vadd.f32 %v1045_v25, %v1041_v24 }
 0x563   : > { %v1048_v27 = vsel %vm1047_vm0, %v1046_v26, 0.0 }
 0x564   : > { %v1049_v28 = vrot.slane %v1048_v27, 4 }
 0x566   : > { %v1050_v29 = vadd.f32 %v1049_v28, %v1048_v27 }
 0x568   : > { %v1051_v32 = vrot.slane %v1050_v29, 2 }
 0x56a   : > { %v1052_v33 = vadd.f32 %v1051_v32, %v1050_v29 }
 0x56c   : > { %v1053_v34 = vrot.slane %v1052_v33, 1 }
 0x56e   : > { %v1054_v35 = vadd.f32 %v1053_v34, %v1052_v33 }
 0x570   : > { %1073 = vperm.xlu0 %1212, %v1054_v35  }
 0x5b7   : > { %v1019_v42 = vpop.permute.xlu1 %1018 }
 0x5b8   : > { %v1021_v43 = vadd.f32 %v1019_v42, %v1015_v40 }
 0x5ba   : > { %v1022_v44 = vmul.f32 %v1166_v41, %v1021_v43 }
 0x5bc   : > { %v1024_v45 = vsel %vm1023_vm2, %v1022_v44, 0.0 }
 0x5bd   : > { %v1025_v46 = vrot.slane %v1024_v45, 4 }
 0x5bf   : > { %v1026_v47 = vadd.f32 %v1025_v46, %v1024_v45 }
 0x5c1   : > { %v1027_v48 = vrot.slane %v1026_v47, 2 }
 0x5c3   : > { %v1028_v49 = vadd.f32 %v1027_v48, %v1026_v47 }
 0x5c5   : > { %v1029_v50 = vrot.slane %v1028_v49, 1 }
 0x5c7   : > { %v1030_v51 = vadd.f32 %v1029_v50, %v1028_v49 }
 0x5c9   : > { %1066 = vperm.xlu2 %1211, %v1030_v51  }
 0x5e2   : > { %v1074_v54 = vpop.permute.xlu0 %1073 }
 0x623   : > { %v1067_v53 = vpop.permute.xlu2 %1066 }
 0x624   : > { %v1069_v55 = vsel %vm1063_vm7, %v1067_v53, %v1062_v7 }
 0x625   : > { %v1076_v56 = vsel %vm1070_vm8, %v1074_v54, %v1069_v55 }
 0x626   : > { %1077 = vst [vmem:[%s226_s24] sm:$0xff] %v1076_v56 }
 0x627 PF: > { %s16_s15 = sadd.s32 1, %s1301_s15  }
 0x628   : > { %p13_p7 = scmp.ge.s32.totalorder %s16_s15, 4  }
 0x62a   :  { %15 = sbr.rel (!%p13_p7) target bundleno = 2 (0x2), region = 75 }
 0x62f   :  { %1097 = vsyncpa [#allocation3], 1 }
 0x630   :  { %1099 = vsyncpa [#allocation3 + $0x1], 1 }
 0x631   :  { %1100 = vsyncpa [#allocation5], 1 }

</bundles_post_ra>
